<compile_context>
chip_gen: v6e
topology: v6e:2x2x1
jax: 0.10.0
libtpu: 0.0.40
codegen_flags: <defaults>
</compile_context>

<pallas_src>
import functools

import jax
import jax.numpy as jnp
from jax.experimental import pallas as pl
from jax.experimental.pallas import tpu as pltpu


# --------------------------------------------------------------------------- #
# Mesh-only precompute (plain JAX, hoisted out of the kernel, cacheable).
# --------------------------------------------------------------------------- #
def _dist2att(mesh_out, mesh_in, lmda, locality):
    """Batch-independent attention matrix (H, L_out, L_in)."""
    diff = mesh_out[:, None, :] - mesh_in[None, :, :]                  # (Lout, Lin, 2)
    m_dist = jnp.sum(diff * diff, axis=-1)                             # (Lout, Lin)
    scale = jnp.tan(0.25 * jnp.pi * (1.0 - 1e-7) * (1.0 + jnp.sin(lmda)))  # (H,1,1)
    sd = (m_dist[None, :, :] * scale).astype(jnp.float32)              # (H, Lout, Lin)
    # TODO(synk): torch.quantile needs a per-row sort; no Mosaic lowering, so the
    # quantile threshold stays in plain JAX (same linear interpolation as torch).
    thr = jnp.quantile(sd, locality, axis=-1, keepdims=True)           # (H, Lout, 1)
    sd = jnp.where(sd <= thr, sd, jnp.float32(jnp.finfo(jnp.float32).max))
    return jax.nn.softmax(-sd, axis=-1)                                # (H, Lout, Lin)


# --------------------------------------------------------------------------- #
# Kernel
# --------------------------------------------------------------------------- #
def _posatt_kernel(a_ref, u_ref, o_ref, ufold_ref, *, n_head, l_out, in_dim, bt):
    # a_ref:     (H*L_out, L_in)   attention, grid-invariant (resident in VMEM)
    # u_ref:     (bt, L_in, D)     inputs in their native layout
    # o_ref:     (bt, L_out, H*D)  final 'bnhd'-flattened layout
    # ufold_ref: (L_in, bt*D)      VMEM scratch: batch folded into lanes
    D = in_dim
    # Input fold (VMEM, static 2-D copies) -- replaces the wrapper-side
    # transpose/reshape HBM round trip.
    for b in range(bt):
        ufold_ref[:, b * D:(b + 1) * D] = u_ref[b]

    # One MXU matmul per grid step, f32 accumulation.
    acc = jnp.dot(a_ref[...], ufold_ref[...], preferred_element_type=jnp.float32)

    # Output unfold (h,n)x(b,d) -> (b,n)x(h,d) with static 2-D slices in VMEM.
    # The HBM writeback of o_ref is one lane-dense (H*D-wide) block per tile.
    for h in range(n_head):
        rows = acc[h * l_out:(h + 1) * l_out, :]                  # (L_out, bt*D)
        for b in range(bt):
            o_ref[b, :, h * D:(h + 1) * D] = (
                rows[:, b * D:(b + 1) * D].astype(o_ref.dtype))


# --------------------------------------------------------------------------- #
# Wrapper
# --------------------------------------------------------------------------- #
def _pick_batch_tile(batch, l_in, l_out, n_head, in_dim, itemsize, vmem_budget):
    """Largest divisor of `batch` whose VMEM footprint fits the budget.

    Prefers leaving >= 2 grid steps so the 'parallel' batch axis can shard
    across the two TensorCores on v7x (grid=(1,) would idle half the chip).
    """
    M = n_head * l_out

    def fits(bt):
        a_bytes = M * l_in * itemsize                    # single-buffered A
        u_bytes = 2 * bt * l_in * in_dim * itemsize      # double-buffered input
        fold_bytes = l_in * bt * in_dim * itemsize       # fold scratch
        o_bytes = 2 * bt * l_out * n_head * in_dim * 4   # double-buffered f32 out
        acc_bytes = M * bt * in_dim * 4                  # matmul result value
        # x2 safety factor for (8,128) layout padding at small dims.
        return 2 * (a_bytes + u_bytes + fold_bytes + o_bytes + acc_bytes) <= vmem_budget

    divisors = sorted((d for d in range(1, batch + 1) if batch % d == 0), reverse=True)
    for bt in divisors:
        if bt == batch and batch > 1:
            continue                       # keep >= 2 grid steps (v7x megacore)
        if fits(bt):
            return bt
    return 1


def posatt_cross_fixed_apply(att, inputs, *, compute_dtype=jnp.bfloat16,
                             vmem_limit_bytes=None):
    """att: (H, L_out, L_in) f32 (precomputed); inputs: (B, L_in, D).

    Returns (B, L_out, H*D) float32, identical layout to the torch module.
    """
    H, L_out, L_in = att.shape
    B, L_in2, D = inputs.shape
    assert L_in == L_in2
    M = H * L_out
    itemsize = jnp.dtype(compute_dtype).itemsize

    # Per-generation VMEM budgeting: v7x has 64 MiB per TC vs 128 MiB on v5e/v6e.
    try:
        vmem_physical = pltpu.get_tpu_info().vmem_capacity_bytes
    except Exception:
        vmem_physical = 64 * 1024 * 1024
    if vmem_limit_bytes is None:
        vmem_limit_bytes = min(int(0.75 * vmem_physical), 96 * 1024 * 1024)
    vmem_budget = int(0.6 * vmem_limit_bytes)

    bt = _pick_batch_tile(B, L_in, L_out, H, D, itemsize, vmem_budget)
    grid = (B // bt,)

    a_flat = att.reshape(M, L_in).astype(compute_dtype)   # head-major rows, resident
    u = inputs.astype(compute_dtype)                       # native layout, no transpose

    kernel = functools.partial(_posatt_kernel, n_head=H, l_out=L_out, in_dim=D, bt=bt)

    cost = pl.CostEstimate(
        flops=2 * M * L_in * B * D,
        transcendentals=0,
        bytes_accessed=(M * L_in * itemsize
                        + B * L_in * D * itemsize
                        + B * L_out * H * D * 4),
    )

    def build(single_buffer_a):
        a_kwargs = {}
        if single_buffer_a:
            # Grid-invariant block: one buffer is enough, halves A's footprint.
            a_kwargs["pipeline_mode"] = pl.Buffered(1)
        return pl.pallas_call(
            kernel,
            out_shape=jax.ShapeDtypeStruct((B, L_out, H * D), jnp.float32),
            grid_spec=pltpu.PrefetchScalarGridSpec(
                num_scalar_prefetch=0,
                grid=grid,
                in_specs=[
                    # attention: constant index_map -> stays resident in VMEM
                    pl.BlockSpec((M, L_in), lambda j: (0, 0), **a_kwargs),
                    # inputs: native (B, L_in, D) layout, one batch tile per step
                    pl.BlockSpec((bt, L_in, D), lambda j: (j, 0, 0)),
                ],
                out_specs=pl.BlockSpec((bt, L_out, H * D), lambda j: (j, 0, 0)),
                scratch_shapes=[pltpu.VMEM((L_in, bt * D), compute_dtype)],
            ),
            compiler_params=pltpu.CompilerParams(
                dimension_semantics=("parallel",),       # batch tiles independent
                vmem_limit_bytes=vmem_limit_bytes),
            cost_estimate=cost,
        )

    try:
        return build(True)(a_flat, u)
    except Exception:
        # Fallback if pl.Buffered(1) is unsupported by this jax/Mosaic version.
        return build(False)(a_flat, u)


def posatt_cross_fixed_forward(mesh_out, mesh_in, inputs, lmda, locality,
                               *, compute_dtype=jnp.bfloat16):
    # NOTE: when mesh_out / mesh_in / lmda are static across calls, precompute
    # `att` once with _dist2att and call posatt_cross_fixed_apply directly
    # (avoids re-running the quantile sort + softmax every call).
    att = _dist2att(mesh_out, mesh_in, lmda, locality)
    return posatt_cross_fixed_apply(att, inputs, compute_dtype=compute_dtype)


# --------------------------------------------------------------------------- #
# Torch-faithful reference (plain JAX)
# --------------------------------------------------------------------------- #
def _reference(mesh_out, mesh_in, inputs, lmda, locality):
    diff = mesh_out[:, None, :] - mesh_in[None, :, :]
    m_dist = jnp.sum(diff * diff, axis=-1)
    scale = jnp.tan(0.25 * jnp.pi * (1 - 1e-7) * (1.0 + jnp.sin(lmda)))
    sd = m_dist[None] * scale
    thr = jnp.quantile(sd, locality, axis=-1, keepdims=True)
    sd = jnp.where(sd <= thr, sd, jnp.float32(jnp.finfo(jnp.float32).max))
    att = jax.nn.softmax(-sd, axis=-1)
    conv = jnp.einsum('hnj,bjd->bnhd', att, inputs,
                      precision=jax.lax.Precision.HIGHEST)
    B = inputs.shape[0]
    return conv.reshape(B, -1, lmda.shape[0] * inputs.shape[-1])


if __name__ == "__main__":
    key = jax.random.PRNGKey(0)
    k1, k2, k3, k4 = jax.random.split(key, 4)

    n_head, in_dim, locality = 4, 32, 0.5
    batch, L_out, L_in = 8, 16, 24

    lmda = jax.random.uniform(k1, (n_head, 1, 1), dtype=jnp.float32)
    mesh_out = jax.random.uniform(k2, (L_out, 2), dtype=jnp.float32)
    mesh_in = jax.random.uniform(k3, (L_in, 2), dtype=jnp.float32)
    inputs = jax.random.normal(k4, (batch, L_in, in_dim), dtype=jnp.float32)

    ref = _reference(mesh_out, mesh_in, inputs, lmda, locality)

    # Mesh-only attention computed once and reused for both kernel runs.
    att = _dist2att(mesh_out, mesh_in, lmda, locality)

    # f32 operand path (tolerance allows for MXU f32 pass decomposition).
    out_f32 = jax.block_until_ready(
        posatt_cross_fixed_apply(att, inputs, compute_dtype=jnp.float32))
    assert out_f32.shape == (batch, L_out, n_head * in_dim), out_f32.shape
    err_f32 = float(jnp.max(jnp.abs(out_f32 - ref)))
    assert jnp.allclose(out_f32, ref, rtol=2e-2, atol=2e-2), err_f32

    # bf16 operand path (bandwidth-optimized; f32 accumulation on the MXU).
    out_bf16 = jax.block_until_ready(
        posatt_cross_fixed_apply(att, inputs, compute_dtype=jnp.bfloat16))
    assert out_bf16.shape == (batch, L_out, n_head * in_dim), out_bf16.shape
    err_bf16 = float(jnp.max(jnp.abs(out_bf16 - ref)))
    assert jnp.allclose(out_bf16, ref, rtol=6e-2, atol=6e-2), err_bf16

    print("KERNEL_OK")
</pallas_src>

<mosaic_0001>
module attributes {stable_mosaic.version = 11 : i64} {
  func.func @_posatt_kernel(%arg0: i32, %arg1: memref<64x24xf32, #tpu.memory_space<vmem>>, %arg2: memref<4x24x32xf32, #tpu.memory_space<vmem>>, %arg3: memref<4x16x128xf32, #tpu.memory_space<vmem>>, %arg4: memref<24x128xf32, #tpu.memory_space<vmem>>) attributes {dimension_semantics = [#tpu.dimension_semantics<parallel>], iteration_bounds = array<i64: 2>, scalar_prefetch = 0 : i64, scratch_operands = 1 : i64, tpu.core_type = #tpu.core_type<tc>, window_params = [{pipeline_mode = #tpu.pipeline_mode<synchronous>, transform_indices = @transform_0, window_bounds = array<i64: 64, 24>}, {transform_indices = @transform_1, window_bounds = array<i64: 4, 24, 32>}, {transform_indices = @transform_2, window_bounds = array<i64: 4, 16, 128>}]} {
    %c0 = arith.constant 0 : index
    %c0_0 = arith.constant 0 : index
    %c0_1 = arith.constant 0 : index
    %0 = vector.load %arg2[%c0, %c0_0, %c0_1] : memref<4x24x32xf32, #tpu.memory_space<vmem>>, vector<1x24x32xf32>
    %1 = vector.shape_cast %0 : vector<1x24x32xf32> to vector<24x32xf32>
    %c0_2 = arith.constant 0 : index
    %c0_3 = arith.constant 0 : index
    %2 = vector.load %arg4[%c0_2, %c0_3] : memref<24x128xf32, #tpu.memory_space<vmem>>, vector<24x32xf32>
    tpu.vector_store %arg4[%c0_2, %c0_3], %1 {strides = array<i32>} : memref<24x128xf32, #tpu.memory_space<vmem>>, vector<24x32xf32>,
    %c1 = arith.constant 1 : index
    %c0_4 = arith.constant 0 : index
    %c0_5 = arith.constant 0 : index
    %3 = vector.load %arg2[%c1, %c0_4, %c0_5] : memref<4x24x32xf32, #tpu.memory_space<vmem>>, vector<1x24x32xf32>
    %4 = vector.shape_cast %3 : vector<1x24x32xf32> to vector<24x32xf32>
    %c0_6 = arith.constant 0 : index
    %c32 = arith.constant 32 : index
    %5 = vector.load %arg4[%c0_6, %c32] : memref<24x128xf32, #tpu.memory_space<vmem>>, vector<24x32xf32>
    tpu.vector_store %arg4[%c0_6, %c32], %4 {strides = array<i32>} : memref<24x128xf32, #tpu.memory_space<vmem>>, vector<24x32xf32>,
    %c2 = arith.constant 2 : index
    %c0_7 = arith.constant 0 : index
    %c0_8 = arith.constant 0 : index
    %6 = vector.load %arg2[%c2, %c0_7, %c0_8] : memref<4x24x32xf32, #tpu.memory_space<vmem>>, vector<1x24x32xf32>
    %7 = vector.shape_cast %6 : vector<1x24x32xf32> to vector<24x32xf32>
    %c0_9 = arith.constant 0 : index
    %c64 = arith.constant 64 : index
    %8 = vector.load %arg4[%c0_9, %c64] : memref<24x128xf32, #tpu.memory_space<vmem>>, vector<24x32xf32>
    tpu.vector_store %arg4[%c0_9, %c64], %7 {strides = array<i32>} : memref<24x128xf32, #tpu.memory_space<vmem>>, vector<24x32xf32>,
    %c3 = arith.constant 3 : index
    %c0_10 = arith.constant 0 : index
    %c0_11 = arith.constant 0 : index
    %9 = vector.load %arg2[%c3, %c0_10, %c0_11] : memref<4x24x32xf32, #tpu.memory_space<vmem>>, vector<1x24x32xf32>
    %10 = vector.shape_cast %9 : vector<1x24x32xf32> to vector<24x32xf32>
    %c0_12 = arith.constant 0 : index
    %c96 = arith.constant 96 : index
    %11 = vector.load %arg4[%c0_12, %c96] : memref<24x128xf32, #tpu.memory_space<vmem>>, vector<24x32xf32>
    tpu.vector_store %arg4[%c0_12, %c96], %10 {strides = array<i32>} : memref<24x128xf32, #tpu.memory_space<vmem>>, vector<24x32xf32>,
    %c0_13 = arith.constant 0 : index
    %c0_14 = arith.constant 0 : index
    %12 = vector.load %arg1[%c0_13, %c0_14] : memref<64x24xf32, #tpu.memory_space<vmem>>, vector<64x24xf32>
    %c0_15 = arith.constant 0 : index
    %c0_16 = arith.constant 0 : index
    %13 = vector.load %arg4[%c0_15, %c0_16] : memref<24x128xf32, #tpu.memory_space<vmem>>, vector<24x128xf32>
    %cst = arith.constant dense<0.000000e+00> : vector<64x128xf32>
    %14 = tpu.matmul %12, %13, %cst {dimension_numbers = #tpu.dot_dimension_numbers<[1], [0], [0], [1], [0, 0, 1, 1], [], []>} : vector<64x24xf32>, vector<24x128xf32>, vector<64x128xf32> -> vector<64x128xf32>
    %15 = vector.extract_strided_slice %14 {offsets = [0, 0], sizes = [16, 128], strides = [1, 1]} : vector<64x128xf32> to vector<16x128xf32>
    %16 = vector.extract_strided_slice %15 {offsets = [0, 0], sizes = [16, 32], strides = [1, 1]} : vector<16x128xf32> to vector<16x32xf32>
    %c0_17 = arith.constant 0 : index
    %c0_18 = arith.constant 0 : index
    %c0_19 = arith.constant 0 : index
    %17 = vector.load %arg3[%c0_17, %c0_18, %c0_19] : memref<4x16x128xf32, #tpu.memory_space<vmem>>, vector<1x16x32xf32>
    %18 = vector.shape_cast %17 : vector<1x16x32xf32> to vector<16x32xf32>
    %19 = vector.shape_cast %16 : vector<16x32xf32> to vector<1x16x32xf32>
    tpu.vector_store %arg3[%c0_17, %c0_18, %c0_19], %19 {strides = array<i32>} : memref<4x16x128xf32, #tpu.memory_space<vmem>>, vector<1x16x32xf32>,
    %20 = vector.extract_strided_slice %15 {offsets = [0, 32], sizes = [16, 32], strides = [1, 1]} : vector<16x128xf32> to vector<16x32xf32>
    %c1_20 = arith.constant 1 : index
    %c0_21 = arith.constant 0 : index
    %c0_22 = arith.constant 0 : index
    %21 = vector.load %arg3[%c1_20, %c0_21, %c0_22] : memref<4x16x128xf32, #tpu.memory_space<vmem>>, vector<1x16x32xf32>
    %22 = vector.shape_cast %21 : vector<1x16x32xf32> to vector<16x32xf32>
    %23 = vector.shape_cast %20 : vector<16x32xf32> to vector<1x16x32xf32>
    tpu.vector_store %arg3[%c1_20, %c0_21, %c0_22], %23 {strides = array<i32>} : memref<4x16x128xf32, #tpu.memory_space<vmem>>, vector<1x16x32xf32>,
    %24 = vector.extract_strided_slice %15 {offsets = [0, 64], sizes = [16, 32], strides = [1, 1]} : vector<16x128xf32> to vector<16x32xf32>
    %c2_23 = arith.constant 2 : index
    %c0_24 = arith.constant 0 : index
    %c0_25 = arith.constant 0 : index
    %25 = vector.load %arg3[%c2_23, %c0_24, %c0_25] : memref<4x16x128xf32, #tpu.memory_space<vmem>>, vector<1x16x32xf32>
    %26 = vector.shape_cast %25 : vector<1x16x32xf32> to vector<16x32xf32>
    %27 = vector.shape_cast %24 : vector<16x32xf32> to vector<1x16x32xf32>
    tpu.vector_store %arg3[%c2_23, %c0_24, %c0_25], %27 {strides = array<i32>} : memref<4x16x128xf32, #tpu.memory_space<vmem>>, vector<1x16x32xf32>,
    %28 = vector.extract_strided_slice %15 {offsets = [0, 96], sizes = [16, 32], strides = [1, 1]} : vector<16x128xf32> to vector<16x32xf32>
    %c3_26 = arith.constant 3 : index
    %c0_27 = arith.constant 0 : index
    %c0_28 = arith.constant 0 : index
    %29 = vector.load %arg3[%c3_26, %c0_27, %c0_28] : memref<4x16x128xf32, #tpu.memory_space<vmem>>, vector<1x16x32xf32>
    %30 = vector.shape_cast %29 : vector<1x16x32xf32> to vector<16x32xf32>
    %31 = vector.shape_cast %28 : vector<16x32xf32> to vector<1x16x32xf32>
    tpu.vector_store %arg3[%c3_26, %c0_27, %c0_28], %31 {strides = array<i32>} : memref<4x16x128xf32, #tpu.memory_space<vmem>>, vector<1x16x32xf32>,
    %32 = vector.extract_strided_slice %14 {offsets = [16, 0], sizes = [16, 128], strides = [1, 1]} : vector<64x128xf32> to vector<16x128xf32>
    %33 = vector.extract_strided_slice %32 {offsets = [0, 0], sizes = [16, 32], strides = [1, 1]} : vector<16x128xf32> to vector<16x32xf32>
    %c0_29 = arith.constant 0 : index
    %c0_30 = arith.constant 0 : index
    %c32_31 = arith.constant 32 : index
    %34 = vector.load %arg3[%c0_29, %c0_30, %c32_31] : memref<4x16x128xf32, #tpu.memory_space<vmem>>, vector<1x16x32xf32>
    %35 = vector.shape_cast %34 : vector<1x16x32xf32> to vector<16x32xf32>
    %36 = vector.shape_cast %33 : vector<16x32xf32> to vector<1x16x32xf32>
    tpu.vector_store %arg3[%c0_29, %c0_30, %c32_31], %36 {strides = array<i32>} : memref<4x16x128xf32, #tpu.memory_space<vmem>>, vector<1x16x32xf32>,
    %37 = vector.extract_strided_slice %32 {offsets = [0, 32], sizes = [16, 32], strides = [1, 1]} : vector<16x128xf32> to vector<16x32xf32>
    %c1_32 = arith.constant 1 : index
    %c0_33 = arith.constant 0 : index
    %c32_34 = arith.constant 32 : index
    %38 = vector.load %arg3[%c1_32, %c0_33, %c32_34] : memref<4x16x128xf32, #tpu.memory_space<vmem>>, vector<1x16x32xf32>
    %39 = vector.shape_cast %38 : vector<1x16x32xf32> to vector<16x32xf32>
    %40 = vector.shape_cast %37 : vector<16x32xf32> to vector<1x16x32xf32>
    tpu.vector_store %arg3[%c1_32, %c0_33, %c32_34], %40 {strides = array<i32>} : memref<4x16x128xf32, #tpu.memory_space<vmem>>, vector<1x16x32xf32>,
    %41 = vector.extract_strided_slice %32 {offsets = [0, 64], sizes = [16, 32], strides = [1, 1]} : vector<16x128xf32> to vector<16x32xf32>
    %c2_35 = arith.constant 2 : index
    %c0_36 = arith.constant 0 : index
    %c32_37 = arith.constant 32 : index
    %42 = vector.load %arg3[%c2_35, %c0_36, %c32_37] : memref<4x16x128xf32, #tpu.memory_space<vmem>>, vector<1x16x32xf32>
    %43 = vector.shape_cast %42 : vector<1x16x32xf32> to vector<16x32xf32>
    %44 = vector.shape_cast %41 : vector<16x32xf32> to vector<1x16x32xf32>
    tpu.vector_store %arg3[%c2_35, %c0_36, %c32_37], %44 {strides = array<i32>} : memref<4x16x128xf32, #tpu.memory_space<vmem>>, vector<1x16x32xf32>,
    %45 = vector.extract_strided_slice %32 {offsets = [0, 96], sizes = [16, 32], strides = [1, 1]} : vector<16x128xf32> to vector<16x32xf32>
    %c3_38 = arith.constant 3 : index
    %c0_39 = arith.constant 0 : index
    %c32_40 = arith.constant 32 : index
    %46 = vector.load %arg3[%c3_38, %c0_39, %c32_40] : memref<4x16x128xf32, #tpu.memory_space<vmem>>, vector<1x16x32xf32>
    %47 = vector.shape_cast %46 : vector<1x16x32xf32> to vector<16x32xf32>
    %48 = vector.shape_cast %45 : vector<16x32xf32> to vector<1x16x32xf32>
    tpu.vector_store %arg3[%c3_38, %c0_39, %c32_40], %48 {strides = array<i32>} : memref<4x16x128xf32, #tpu.memory_space<vmem>>, vector<1x16x32xf32>,
    %49 = vector.extract_strided_slice %14 {offsets = [32, 0], sizes = [16, 128], strides = [1, 1]} : vector<64x128xf32> to vector<16x128xf32>
    %50 = vector.extract_strided_slice %49 {offsets = [0, 0], sizes = [16, 32], strides = [1, 1]} : vector<16x128xf32> to vector<16x32xf32>
    %c0_41 = arith.constant 0 : index
    %c0_42 = arith.constant 0 : index
    %c64_43 = arith.constant 64 : index
    %51 = vector.load %arg3[%c0_41, %c0_42, %c64_43] : memref<4x16x128xf32, #tpu.memory_space<vmem>>, vector<1x16x32xf32>
    %52 = vector.shape_cast %51 : vector<1x16x32xf32> to vector<16x32xf32>
    %53 = vector.shape_cast %50 : vector<16x32xf32> to vector<1x16x32xf32>
    tpu.vector_store %arg3[%c0_41, %c0_42, %c64_43], %53 {strides = array<i32>} : memref<4x16x128xf32, #tpu.memory_space<vmem>>, vector<1x16x32xf32>,
    %54 = vector.extract_strided_slice %49 {offsets = [0, 32], sizes = [16, 32], strides = [1, 1]} : vector<16x128xf32> to vector<16x32xf32>
    %c1_44 = arith.constant 1 : index
    %c0_45 = arith.constant 0 : index
    %c64_46 = arith.constant 64 : index
    %55 = vector.load %arg3[%c1_44, %c0_45, %c64_46] : memref<4x16x128xf32, #tpu.memory_space<vmem>>, vector<1x16x32xf32>
    %56 = vector.shape_cast %55 : vector<1x16x32xf32> to vector<16x32xf32>
    %57 = vector.shape_cast %54 : vector<16x32xf32> to vector<1x16x32xf32>
    tpu.vector_store %arg3[%c1_44, %c0_45, %c64_46], %57 {strides = array<i32>} : memref<4x16x128xf32, #tpu.memory_space<vmem>>, vector<1x16x32xf32>,
    %58 = vector.extract_strided_slice %49 {offsets = [0, 64], sizes = [16, 32], strides = [1, 1]} : vector<16x128xf32> to vector<16x32xf32>
    %c2_47 = arith.constant 2 : index
    %c0_48 = arith.constant 0 : index
    %c64_49 = arith.constant 64 : index
    %59 = vector.load %arg3[%c2_47, %c0_48, %c64_49] : memref<4x16x128xf32, #tpu.memory_space<vmem>>, vector<1x16x32xf32>
    %60 = vector.shape_cast %59 : vector<1x16x32xf32> to vector<16x32xf32>
    %61 = vector.shape_cast %58 : vector<16x32xf32> to vector<1x16x32xf32>
    tpu.vector_store %arg3[%c2_47, %c0_48, %c64_49], %61 {strides = array<i32>} : memref<4x16x128xf32, #tpu.memory_space<vmem>>, vector<1x16x32xf32>,
    %62 = vector.extract_strided_slice %49 {offsets = [0, 96], sizes = [16, 32], strides = [1, 1]} : vector<16x128xf32> to vector<16x32xf32>
    %c3_50 = arith.constant 3 : index
    %c0_51 = arith.constant 0 : index
    %c64_52 = arith.constant 64 : index
    %63 = vector.load %arg3[%c3_50, %c0_51, %c64_52] : memref<4x16x128xf32, #tpu.memory_space<vmem>>, vector<1x16x32xf32>
    %64 = vector.shape_cast %63 : vector<1x16x32xf32> to vector<16x32xf32>
    %65 = vector.shape_cast %62 : vector<16x32xf32> to vector<1x16x32xf32>
    tpu.vector_store %arg3[%c3_50, %c0_51, %c64_52], %65 {strides = array<i32>} : memref<4x16x128xf32, #tpu.memory_space<vmem>>, vector<1x16x32xf32>,
    %66 = vector.extract_strided_slice %14 {offsets = [48, 0], sizes = [16, 128], strides = [1, 1]} : vector<64x128xf32> to vector<16x128xf32>
    %67 = vector.extract_strided_slice %66 {offsets = [0, 0], sizes = [16, 32], strides = [1, 1]} : vector<16x128xf32> to vector<16x32xf32>
    %c0_53 = arith.constant 0 : index
    %c0_54 = arith.constant 0 : index
    %c96_55 = arith.constant 96 : index
    %68 = vector.load %arg3[%c0_53, %c0_54, %c96_55] : memref<4x16x128xf32, #tpu.memory_space<vmem>>, vector<1x16x32xf32>
    %69 = vector.shape_cast %68 : vector<1x16x32xf32> to vector<16x32xf32>
    %70 = vector.shape_cast %67 : vector<16x32xf32> to vector<1x16x32xf32>
    tpu.vector_store %arg3[%c0_53, %c0_54, %c96_55], %70 {strides = array<i32>} : memref<4x16x128xf32, #tpu.memory_space<vmem>>, vector<1x16x32xf32>,
    %71 = vector.extract_strided_slice %66 {offsets = [0, 32], sizes = [16, 32], strides = [1, 1]} : vector<16x128xf32> to vector<16x32xf32>
    %c1_56 = arith.constant 1 : index
    %c0_57 = arith.constant 0 : index
    %c96_58 = arith.constant 96 : index
    %72 = vector.load %arg3[%c1_56, %c0_57, %c96_58] : memref<4x16x128xf32, #tpu.memory_space<vmem>>, vector<1x16x32xf32>
    %73 = vector.shape_cast %72 : vector<1x16x32xf32> to vector<16x32xf32>
    %74 = vector.shape_cast %71 : vector<16x32xf32> to vector<1x16x32xf32>
    tpu.vector_store %arg3[%c1_56, %c0_57, %c96_58], %74 {strides = array<i32>} : memref<4x16x128xf32, #tpu.memory_space<vmem>>, vector<1x16x32xf32>,
    %75 = vector.extract_strided_slice %66 {offsets = [0, 64], sizes = [16, 32], strides = [1, 1]} : vector<16x128xf32> to vector<16x32xf32>
    %c2_59 = arith.constant 2 : index
    %c0_60 = arith.constant 0 : index
    %c96_61 = arith.constant 96 : index
    %76 = vector.load %arg3[%c2_59, %c0_60, %c96_61] : memref<4x16x128xf32, #tpu.memory_space<vmem>>, vector<1x16x32xf32>
    %77 = vector.shape_cast %76 : vector<1x16x32xf32> to vector<16x32xf32>
    %78 = vector.shape_cast %75 : vector<16x32xf32> to vector<1x16x32xf32>
    tpu.vector_store %arg3[%c2_59, %c0_60, %c96_61], %78 {strides = array<i32>} : memref<4x16x128xf32, #tpu.memory_space<vmem>>, vector<1x16x32xf32>,
    %79 = vector.extract_strided_slice %66 {offsets = [0, 96], sizes = [16, 32], strides = [1, 1]} : vector<16x128xf32> to vector<16x32xf32>
    %c3_62 = arith.constant 3 : index
    %c0_63 = arith.constant 0 : index
    %c96_64 = arith.constant 96 : index
    %80 = vector.load %arg3[%c3_62, %c0_63, %c96_64] : memref<4x16x128xf32, #tpu.memory_space<vmem>>, vector<1x16x32xf32>
    %81 = vector.shape_cast %80 : vector<1x16x32xf32> to vector<16x32xf32>
    %82 = vector.shape_cast %79 : vector<16x32xf32> to vector<1x16x32xf32>
    tpu.vector_store %arg3[%c3_62, %c0_63, %c96_64], %82 {strides = array<i32>} : memref<4x16x128xf32, #tpu.memory_space<vmem>>, vector<1x16x32xf32>,
    return
  }
  func.func @transform_0(%arg0: i32) -> (i32, i32) {
    %c0_i32 = arith.constant 0 : i32
    %c0_i32_0 = arith.constant 0 : i32
    %c0_i32_1 = arith.constant 0 : i32
    return %c0_i32, %c0_i32_0 : i32, i32
  }
  func.func @transform_1(%arg0: i32) -> (i32, i32, i32) {
    %c0_i32 = arith.constant 0 : i32
    %c0_i32_0 = arith.constant 0 : i32
    %c0_i32_1 = arith.constant 0 : i32
    return %arg0, %c0_i32, %c0_i32_0 : i32, i32, i32
  }
  func.func @transform_2(%arg0: i32) -> (i32, i32, i32) {
    %c0_i32 = arith.constant 0 : i32
    %c0_i32_0 = arith.constant 0 : i32
    %c0_i32_1 = arith.constant 0 : i32
    return %arg0, %c0_i32, %c0_i32_0 : i32, i32, i32
  }
}

module attributes {stable_mosaic.version = 11 : i64} {
  func.func @_posatt_kernel(%arg0: i32, %arg1: memref<64x24xf32, #tpu.memory_space<vmem>>, %arg2: memref<4x24x32xf32, #tpu.memory_space<vmem>>, %arg3: memref<4x16x128xf32, #tpu.memory_space<vmem>>, %arg4: memref<24x128xf32, #tpu.memory_space<vmem>>) attributes {dimension_semantics = [#tpu.dimension_semantics<parallel>], iteration_bounds = array<i64: 2>, scalar_prefetch = 0 : i64, scratch_operands = 1 : i64, tpu.core_type = #tpu.core_type<tc>, window_params = [{pipeline_mode = #tpu.pipeline_mode<synchronous>, transform_indices = @transform_0, window_bounds = array<i64: 64, 24>}, {transform_indices = @transform_1, window_bounds = array<i64: 4, 24, 32>}, {transform_indices = @transform_2, window_bounds = array<i64: 4, 16, 128>}]} {
    %c0 = arith.constant 0 : index
    %c0_0 = arith.constant 0 : index
    %c0_1 = arith.constant 0 : index
    %0 = vector.load %arg2[%c0, %c0_0, %c0_1] : memref<4x24x32xf32, #tpu.memory_space<vmem>>, vector<1x24x32xf32>
    %1 = vector.shape_cast %0 : vector<1x24x32xf32> to vector<24x32xf32>
    %c0_2 = arith.constant 0 : index
    %c0_3 = arith.constant 0 : index
    %2 = vector.load %arg4[%c0_2, %c0_3] : memref<24x128xf32, #tpu.memory_space<vmem>>, vector<24x32xf32>
    tpu.vector_store %arg4[%c0_2, %c0_3], %1 {strides = array<i32>} : memref<24x128xf32, #tpu.memory_space<vmem>>, vector<24x32xf32>,
    %c1 = arith.constant 1 : index
    %c0_4 = arith.constant 0 : index
    %c0_5 = arith.constant 0 : index
    %3 = vector.load %arg2[%c1, %c0_4, %c0_5] : memref<4x24x32xf32, #tpu.memory_space<vmem>>, vector<1x24x32xf32>
    %4 = vector.shape_cast %3 : vector<1x24x32xf32> to vector<24x32xf32>
    %c0_6 = arith.constant 0 : index
    %c32 = arith.constant 32 : index
    %5 = vector.load %arg4[%c0_6, %c32] : memref<24x128xf32, #tpu.memory_space<vmem>>, vector<24x32xf32>
    tpu.vector_store %arg4[%c0_6, %c32], %4 {strides = array<i32>} : memref<24x128xf32, #tpu.memory_space<vmem>>, vector<24x32xf32>,
    %c2 = arith.constant 2 : index
    %c0_7 = arith.constant 0 : index
    %c0_8 = arith.constant 0 : index
    %6 = vector.load %arg2[%c2, %c0_7, %c0_8] : memref<4x24x32xf32, #tpu.memory_space<vmem>>, vector<1x24x32xf32>
    %7 = vector.shape_cast %6 : vector<1x24x32xf32> to vector<24x32xf32>
    %c0_9 = arith.constant 0 : index
    %c64 = arith.constant 64 : index
    %8 = vector.load %arg4[%c0_9, %c64] : memref<24x128xf32, #tpu.memory_space<vmem>>, vector<24x32xf32>
    tpu.vector_store %arg4[%c0_9, %c64], %7 {strides = array<i32>} : memref<24x128xf32, #tpu.memory_space<vmem>>, vector<24x32xf32>,
    %c3 = arith.constant 3 : index
    %c0_10 = arith.constant 0 : index
    %c0_11 = arith.constant 0 : index
    %9 = vector.load %arg2[%c3, %c0_10, %c0_11] : memref<4x24x32xf32, #tpu.memory_space<vmem>>, vector<1x24x32xf32>
    %10 = vector.shape_cast %9 : vector<1x24x32xf32> to vector<24x32xf32>
    %c0_12 = arith.constant 0 : index
    %c96 = arith.constant 96 : index
    %11 = vector.load %arg4[%c0_12, %c96] : memref<24x128xf32, #tpu.memory_space<vmem>>, vector<24x32xf32>
    tpu.vector_store %arg4[%c0_12, %c96], %10 {strides = array<i32>} : memref<24x128xf32, #tpu.memory_space<vmem>>, vector<24x32xf32>,
    %c0_13 = arith.constant 0 : index
    %c0_14 = arith.constant 0 : index
    %12 = vector.load %arg1[%c0_13, %c0_14] : memref<64x24xf32, #tpu.memory_space<vmem>>, vector<64x24xf32>
    %c0_15 = arith.constant 0 : index
    %c0_16 = arith.constant 0 : index
    %13 = vector.load %arg4[%c0_15, %c0_16] : memref<24x128xf32, #tpu.memory_space<vmem>>, vector<24x128xf32>
    %cst = arith.constant dense<0.000000e+00> : vector<64x128xf32>
    %14 = tpu.matmul %12, %13, %cst {dimension_numbers = #tpu.dot_dimension_numbers<[1], [0], [0], [1], [0, 0, 1, 1], [], []>} : vector<64x24xf32>, vector<24x128xf32>, vector<64x128xf32> -> vector<64x128xf32>
    %15 = vector.extract_strided_slice %14 {offsets = [0, 0], sizes = [16, 128], strides = [1, 1]} : vector<64x128xf32> to vector<16x128xf32>
    %16 = vector.extract_strided_slice %15 {offsets = [0, 0], sizes = [16, 32], strides = [1, 1]} : vector<16x128xf32> to vector<16x32xf32>
    %c0_17 = arith.constant 0 : index
    %c0_18 = arith.constant 0 : index
    %c0_19 = arith.constant 0 : index
    %17 = vector.load %arg3[%c0_17, %c0_18, %c0_19] : memref<4x16x128xf32, #tpu.memory_space<vmem>>, vector<1x16x32xf32>
    %18 = vector.shape_cast %17 : vector<1x16x32xf32> to vector<16x32xf32>
    %19 = vector.shape_cast %16 : vector<16x32xf32> to vector<1x16x32xf32>
    tpu.vector_store %arg3[%c0_17, %c0_18, %c0_19], %19 {strides = array<i32>} : memref<4x16x128xf32, #tpu.memory_space<vmem>>, vector<1x16x32xf32>,
    %20 = vector.extract_strided_slice %15 {offsets = [0, 32], sizes = [16, 32], strides = [1, 1]} : vector<16x128xf32> to vector<16x32xf32>
    %c1_20 = arith.constant 1 : index
    %c0_21 = arith.constant 0 : index
    %c0_22 = arith.constant 0 : index
    %21 = vector.load %arg3[%c1_20, %c0_21, %c0_22] : memref<4x16x128xf32, #tpu.memory_space<vmem>>, vector<1x16x32xf32>
    %22 = vector.shape_cast %21 : vector<1x16x32xf32> to vector<16x32xf32>
    %23 = vector.shape_cast %20 : vector<16x32xf32> to vector<1x16x32xf32>
    tpu.vector_store %arg3[%c1_20, %c0_21, %c0_22], %23 {strides = array<i32>} : memref<4x16x128xf32, #tpu.memory_space<vmem>>, vector<1x16x32xf32>,
    %24 = vector.extract_strided_slice %15 {offsets = [0, 64], sizes = [16, 32], strides = [1, 1]} : vector<16x128xf32> to vector<16x32xf32>
    %c2_23 = arith.constant 2 : index
    %c0_24 = arith.constant 0 : index
    %c0_25 = arith.constant 0 : index
    %25 = vector.load %arg3[%c2_23, %c0_24, %c0_25] : memref<4x16x128xf32, #tpu.memory_space<vmem>>, vector<1x16x32xf32>
    %26 = vector.shape_cast %25 : vector<1x16x32xf32> to vector<16x32xf32>
    %27 = vector.shape_cast %24 : vector<16x32xf32> to vector<1x16x32xf32>
    tpu.vector_store %arg3[%c2_23, %c0_24, %c0_25], %27 {strides = array<i32>} : memref<4x16x128xf32, #tpu.memory_space<vmem>>, vector<1x16x32xf32>,
    %28 = vector.extract_strided_slice %15 {offsets = [0, 96], sizes = [16, 32], strides = [1, 1]} : vector<16x128xf32> to vector<16x32xf32>
    %c3_26 = arith.constant 3 : index
    %c0_27 = arith.constant 0 : index
    %c0_28 = arith.constant 0 : index
    %29 = vector.load %arg3[%c3_26, %c0_27, %c0_28] : memref<4x16x128xf32, #tpu.memory_space<vmem>>, vector<1x16x32xf32>
    %30 = vector.shape_cast %29 : vector<1x16x32xf32> to vector<16x32xf32>
    %31 = vector.shape_cast %28 : vector<16x32xf32> to vector<1x16x32xf32>
    tpu.vector_store %arg3[%c3_26, %c0_27, %c0_28], %31 {strides = array<i32>} : memref<4x16x128xf32, #tpu.memory_space<vmem>>, vector<1x16x32xf32>,
    %32 = vector.extract_strided_slice %14 {offsets = [16, 0], sizes = [16, 128], strides = [1, 1]} : vector<64x128xf32> to vector<16x128xf32>
    %33 = vector.extract_strided_slice %32 {offsets = [0, 0], sizes = [16, 32], strides = [1, 1]} : vector<16x128xf32> to vector<16x32xf32>
    %c0_29 = arith.constant 0 : index
    %c0_30 = arith.constant 0 : index
    %c32_31 = arith.constant 32 : index
    %34 = vector.load %arg3[%c0_29, %c0_30, %c32_31] : memref<4x16x128xf32, #tpu.memory_space<vmem>>, vector<1x16x32xf32>
    %35 = vector.shape_cast %34 : vector<1x16x32xf32> to vector<16x32xf32>
    %36 = vector.shape_cast %33 : vector<16x32xf32> to vector<1x16x32xf32>
    tpu.vector_store %arg3[%c0_29, %c0_30, %c32_31], %36 {strides = array<i32>} : memref<4x16x128xf32, #tpu.memory_space<vmem>>, vector<1x16x32xf32>,
    %37 = vector.extract_strided_slice %32 {offsets = [0, 32], sizes = [16, 32], strides = [1, 1]} : vector<16x128xf32> to vector<16x32xf32>
    %c1_32 = arith.constant 1 : index
    %c0_33 = arith.constant 0 : index
    %c32_34 = arith.constant 32 : index
    %38 = vector.load %arg3[%c1_32, %c0_33, %c32_34] : memref<4x16x128xf32, #tpu.memory_space<vmem>>, vector<1x16x32xf32>
    %39 = vector.shape_cast %38 : vector<1x16x32xf32> to vector<16x32xf32>
    %40 = vector.shape_cast %37 : vector<16x32xf32> to vector<1x16x32xf32>
    tpu.vector_store %arg3[%c1_32, %c0_33, %c32_34], %40 {strides = array<i32>} : memref<4x16x128xf32, #tpu.memory_space<vmem>>, vector<1x16x32xf32>,
    %41 = vector.extract_strided_slice %32 {offsets = [0, 64], sizes = [16, 32], strides = [1, 1]} : vector<16x128xf32> to vector<16x32xf32>
    %c2_35 = arith.constant 2 : index
    %c0_36 = arith.constant 0 : index
    %c32_37 = arith.constant 32 : index
    %42 = vector.load %arg3[%c2_35, %c0_36, %c32_37] : memref<4x16x128xf32, #tpu.memory_space<vmem>>, vector<1x16x32xf32>
    %43 = vector.shape_cast %42 : vector<1x16x32xf32> to vector<16x32xf32>
    %44 = vector.shape_cast %41 : vector<16x32xf32> to vector<1x16x32xf32>
    tpu.vector_store %arg3[%c2_35, %c0_36, %c32_37], %44 {strides = array<i32>} : memref<4x16x128xf32, #tpu.memory_space<vmem>>, vector<1x16x32xf32>,
    %45 = vector.extract_strided_slice %32 {offsets = [0, 96], sizes = [16, 32], strides = [1, 1]} : vector<16x128xf32> to vector<16x32xf32>
    %c3_38 = arith.constant 3 : index
    %c0_39 = arith.constant 0 : index
    %c32_40 = arith.constant 32 : index
    %46 = vector.load %arg3[%c3_38, %c0_39, %c32_40] : memref<4x16x128xf32, #tpu.memory_space<vmem>>, vector<1x16x32xf32>
    %47 = vector.shape_cast %46 : vector<1x16x32xf32> to vector<16x32xf32>
    %48 = vector.shape_cast %45 : vector<16x32xf32> to vector<1x16x32xf32>
    tpu.vector_store %arg3[%c3_38, %c0_39, %c32_40], %48 {strides = array<i32>} : memref<4x16x128xf32, #tpu.memory_space<vmem>>, vector<1x16x32xf32>,
    %49 = vector.extract_strided_slice %14 {offsets = [32, 0], sizes = [16, 128], strides = [1, 1]} : vector<64x128xf32> to vector<16x128xf32>
    %50 = vector.extract_strided_slice %49 {offsets = [0, 0], sizes = [16, 32], strides = [1, 1]} : vector<16x128xf32> to vector<16x32xf32>
    %c0_41 = arith.constant 0 : index
    %c0_42 = arith.constant 0 : index
    %c64_43 = arith.constant 64 : index
    %51 = vector.load %arg3[%c0_41, %c0_42, %c64_43] : memref<4x16x128xf32, #tpu.memory_space<vmem>>, vector<1x16x32xf32>
    %52 = vector.shape_cast %51 : vector<1x16x32xf32> to vector<16x32xf32>
    %53 = vector.shape_cast %50 : vector<16x32xf32> to vector<1x16x32xf32>
    tpu.vector_store %arg3[%c0_41, %c0_42, %c64_43], %53 {strides = array<i32>} : memref<4x16x128xf32, #tpu.memory_space<vmem>>, vector<1x16x32xf32>,
    %54 = vector.extract_strided_slice %49 {offsets = [0, 32], sizes = [16, 32], strides = [1, 1]} : vector<16x128xf32> to vector<16x32xf32>
    %c1_44 = arith.constant 1 : index
    %c0_45 = arith.constant 0 : index
    %c64_46 = arith.constant 64 : index
    %55 = vector.load %arg3[%c1_44, %c0_45, %c64_46] : memref<4x16x128xf32, #tpu.memory_space<vmem>>, vector<1x16x32xf32>
    %56 = vector.shape_cast %55 : vector<1x16x32xf32> to vector<16x32xf32>
    %57 = vector.shape_cast %54 : vector<16x32xf32> to vector<1x16x32xf32>
    tpu.vector_store %arg3[%c1_44, %c0_45, %c64_46], %57 {strides = array<i32>} : memref<4x16x128xf32, #tpu.memory_space<vmem>>, vector<1x16x32xf32>,
    %58 = vector.extract_strided_slice %49 {offsets = [0, 64], sizes = [16, 32], strides = [1, 1]} : vector<16x128xf32> to vector<16x32xf32>
    %c2_47 = arith.constant 2 : index
    %c0_48 = arith.constant 0 : index
    %c64_49 = arith.constant 64 : index
    %59 = vector.load %arg3[%c2_47, %c0_48, %c64_49] : memref<4x16x128xf32, #tpu.memory_space<vmem>>, vector<1x16x32xf32>
    %60 = vector.shape_cast %59 : vector<1x16x32xf32> to vector<16x32xf32>
    %61 = vector.shape_cast %58 : vector<16x32xf32> to vector<1x16x32xf32>
    tpu.vector_store %arg3[%c2_47, %c0_48, %c64_49], %61 {strides = array<i32>} : memref<4x16x128xf32, #tpu.memory_space<vmem>>, vector<1x16x32xf32>,
    %62 = vector.extract_strided_slice %49 {offsets = [0, 96], sizes = [16, 32], strides = [1, 1]} : vector<16x128xf32> to vector<16x32xf32>
    %c3_50 = arith.constant 3 : index
    %c0_51 = arith.constant 0 : index
    %c64_52 = arith.constant 64 : index
    %63 = vector.load %arg3[%c3_50, %c0_51, %c64_52] : memref<4x16x128xf32, #tpu.memory_space<vmem>>, vector<1x16x32xf32>
    %64 = vector.shape_cast %63 : vector<1x16x32xf32> to vector<16x32xf32>
    %65 = vector.shape_cast %62 : vector<16x32xf32> to vector<1x16x32xf32>
    tpu.vector_store %arg3[%c3_50, %c0_51, %c64_52], %65 {strides = array<i32>} : memref<4x16x128xf32, #tpu.memory_space<vmem>>, vector<1x16x32xf32>,
    %66 = vector.extract_strided_slice %14 {offsets = [48, 0], sizes = [16, 128], strides = [1, 1]} : vector<64x128xf32> to vector<16x128xf32>
    %67 = vector.extract_strided_slice %66 {offsets = [0, 0], sizes = [16, 32], strides = [1, 1]} : vector<16x128xf32> to vector<16x32xf32>
    %c0_53 = arith.constant 0 : index
    %c0_54 = arith.constant 0 : index
    %c96_55 = arith.constant 96 : index
    %68 = vector.load %arg3[%c0_53, %c0_54, %c96_55] : memref<4x16x128xf32, #tpu.memory_space<vmem>>, vector<1x16x32xf32>
    %69 = vector.shape_cast %68 : vector<1x16x32xf32> to vector<16x32xf32>
    %70 = vector.shape_cast %67 : vector<16x32xf32> to vector<1x16x32xf32>
    tpu.vector_store %arg3[%c0_53, %c0_54, %c96_55], %70 {strides = array<i32>} : memref<4x16x128xf32, #tpu.memory_space<vmem>>, vector<1x16x32xf32>,
    %71 = vector.extract_strided_slice %66 {offsets = [0, 32], sizes = [16, 32], strides = [1, 1]} : vector<16x128xf32> to vector<16x32xf32>
    %c1_56 = arith.constant 1 : index
    %c0_57 = arith.constant 0 : index
    %c96_58 = arith.constant 96 : index
    %72 = vector.load %arg3[%c1_56, %c0_57, %c96_58] : memref<4x16x128xf32, #tpu.memory_space<vmem>>, vector<1x16x32xf32>
    %73 = vector.shape_cast %72 : vector<1x16x32xf32> to vector<16x32xf32>
    %74 = vector.shape_cast %71 : vector<16x32xf32> to vector<1x16x32xf32>
    tpu.vector_store %arg3[%c1_56, %c0_57, %c96_58], %74 {strides = array<i32>} : memref<4x16x128xf32, #tpu.memory_space<vmem>>, vector<1x16x32xf32>,
    %75 = vector.extract_strided_slice %66 {offsets = [0, 64], sizes = [16, 32], strides = [1, 1]} : vector<16x128xf32> to vector<16x32xf32>
    %c2_59 = arith.constant 2 : index
    %c0_60 = arith.constant 0 : index
    %c96_61 = arith.constant 96 : index
    %76 = vector.load %arg3[%c2_59, %c0_60, %c96_61] : memref<4x16x128xf32, #tpu.memory_space<vmem>>, vector<1x16x32xf32>
    %77 = vector.shape_cast %76 : vector<1x16x32xf32> to vector<16x32xf32>
    %78 = vector.shape_cast %75 : vector<16x32xf32> to vector<1x16x32xf32>
    tpu.vector_store %arg3[%c2_59, %c0_60, %c96_61], %78 {strides = array<i32>} : memref<4x16x128xf32, #tpu.memory_space<vmem>>, vector<1x16x32xf32>,
    %79 = vector.extract_strided_slice %66 {offsets = [0, 96], sizes = [16, 32], strides = [1, 1]} : vector<16x128xf32> to vector<16x32xf32>
    %c3_62 = arith.constant 3 : index
    %c0_63 = arith.constant 0 : index
    %c96_64 = arith.constant 96 : index
    %80 = vector.load %arg3[%c3_62, %c0_63, %c96_64] : memref<4x16x128xf32, #tpu.memory_space<vmem>>, vector<1x16x32xf32>
    %81 = vector.shape_cast %80 : vector<1x16x32xf32> to vector<16x32xf32>
    %82 = vector.shape_cast %79 : vector<16x32xf32> to vector<1x16x32xf32>
    tpu.vector_store %arg3[%c3_62, %c0_63, %c96_64], %82 {strides = array<i32>} : memref<4x16x128xf32, #tpu.memory_space<vmem>>, vector<1x16x32xf32>,
    return
  }
  func.func @transform_0(%arg0: i32) -> (i32, i32) {
    %c0_i32 = arith.constant 0 : i32
    %c0_i32_0 = arith.constant 0 : i32
    %c0_i32_1 = arith.constant 0 : i32
    return %c0_i32, %c0_i32_0 : i32, i32
  }
  func.func @transform_1(%arg0: i32) -> (i32, i32, i32) {
    %c0_i32 = arith.constant 0 : i32
    %c0_i32_0 = arith.constant 0 : i32
    %c0_i32_1 = arith.constant 0 : i32
    return %arg0, %c0_i32, %c0_i32_0 : i32, i32, i32
  }
  func.func @transform_2(%arg0: i32) -> (i32, i32, i32) {
    %c0_i32 = arith.constant 0 : i32
    %c0_i32_0 = arith.constant 0 : i32
    %c0_i32_1 = arith.constant 0 : i32
    return %arg0, %c0_i32, %c0_i32_0 : i32, i32, i32
  }
}

</mosaic_0001>

<bundles_post_ra>
// kernel: tpu_custom_call.1
= control target key start
LH: loop header
LB: loop body
LE: loop exit
PB: predicated region body
PF: predicated region fallthrough
CT: control target
= control target key end

     0   :  { %7 = vsyncpa [#allocation4], 0  ;;  %s1149_s0 = inlined_call_operand.vmem [shape: f32[64,24], index: 0, kind: input, shape index: {}]   ;;  %s1150_s1 = inlined_call_operand.hbm [shape: f32[8,24,32], index: 1, kind: input, shape index: {}]   ;;  %s1151_s2 = inlined_call_operand.hbm [shape: f32[8,16,128], index: 2, kind: output, shape index: {}]  }
   0x1   :  { %9 = vsyncpa [#allocation4 + $0x1], 0 }
   0x2   :  { %10 = vsyncpa [#allocation5], 0 }
   0x3   :  { %12 = vsyncpa [#allocation5 + $0x1], 0  ;;  %s842_s9 = smov 0   ;;  %s844_s10 = smov 0  }
   0x4   :  { %s846_s11 = smov 0   ;;  %s848_s12 = smov 0  }
   0x5 LB: > { %s863_s13 = sadd.s32 4294967295, %s816_s12   ;;  %s576_s14 = sadd.s32 4294967294, %s816_s12   ;;  %s816_s12 = sphi %s848_s12, %s1165_s12   ;;  %s812_s11 = sphi %s846_s11, %s1164_s11   ;;  %s808_s10 = sphi %s844_s10, %s1163_s10   ;;  %s804_s9 = sphi %s842_s9, %s1162_s9  }
   0x6   : > { %s867_s15 = sadd.s32 1, %s816_s12   ;;  %s46_s16 = sadd.s32 1, %s812_s11 }
   0x7   : > { %s43_s17 = ssub.s32 %s816_s12, %s867_s15  ;;  %p53_p0 = scmp.ne.s32.totalorder %s812_s11, %s808_s10 }
   0x8   : > { %p44_p1 = scmp.eq.s32.totalorder %s43_s17, 0  ;;  %p54_p2 = scmp.eq.s32.totalorder %s816_s12, 0 }
   0x9   : > { %p59_p3 = scmp.ne.s32.totalorder %s808_s10, %s804_s9  ;;  %p60_p4 = scmp.eq.s32.totalorder %s863_s13, 0 }
   0xa   : > { %s879_s18 = scalar_select %p44_p1, %s812_s11, %s46_s16  }
   0xb   : > { %p55_p5 = por %p54_p2, %p53_p0  ;;  %p881_p6 = por %p60_p4, %p59_p3 }
   0xc   : > { %p83_p7 = scmp.eq.s32.totalorder %s863_s13, 1  ;;  %p89_p8 = scmp.eq.s32.totalorder %s576_s14, 1 }
   0xd   : > { %s1154_s19 = scalar_select %p881_p6, 1, 0 }
   0xe   : > { %p683_p10 = scmp.lt.s32.totalorder %s816_s12, 2  ;;  %p888_p11 = por %p83_p7, %p53_p0 }
   0xf   : > { %p892_p12 = por %p89_p8, %p59_p3  ;;  %s112_s22 = sand.u32 1, %s812_s11  }
  0x10   : > { %s1155_s20 = scalar_select %p888_p11, 1, 0 }
  0x11   : > { %s1156_s21 = scalar_select %p892_p12, 1, 0 }
  0x12   : > { %s669_s23 = smul.u32 1536, %s816_s12  ;;  %p903_p13 = pnand %p683_p10, %p55_p5 }
  0x13   : > { %s668_s24 = smul.u32 96, %s112_s22  ;;  %s909_s3 = scalar_lea.sflag [#allocation4], %s112_s22 }
  0x14   : > { %s901_s27 = scalar_lea.hbm %s1150_s1, %s669_s23  ;;  %p726_p1 = pneg %p903_p13 }
  0x15   : > { %s116_s29 = scalar_lea.vmem [#allocation3], %s668_s24  ;;  %s724_s4 = scalar_lea.hbm %s901_s27, 1536 }
  0x16   : > { %s124_s30 = sshll.u32 %s116_s29, 4  ;;  %p725_p0 = scmp.ne.s32.totalorder %s901_s27, %s724_s4  ;;  %s907_s30 = int_to_ptr.vmem [resolvable:$true] %s124_s30 }
  0x17   : > { %s729_s7 = scalar_lea.hbm %s1150_s1, 3072  ;;  %p730_p4 = scmp.lt.s32.totalorder %s901_s27, %s1150_s1 }
  0x18   : > { %p727_p2 = pnand %p726_p1, %p725_p0  ;;  %p731_p5 = scmp.lt.s32.totalorder %s729_s7, %s724_s4 }
  0x1a   : > { %p728_p3 = pneg %p727_p2  ;;  %p732_p7 = por %p731_p5, %p730_p4 }
  0x1c   : > { %p733_p8 = pnand %p732_p7, %p728_p3 }
  0x1e   : > { %736 = shalt.err (!%p733_p8)
}
  0x1f   : > { %s737_s16 = scalar_lea.vmem %s907_s30, 1536  ;;  %s818_s17 = smov [#allocation3]  }
  0x20   : > { %p738_p10 = scmp.ne.s32.totalorder %s907_s30, %s737_s16  ;;  %s742_s22 = sshll.u32 %s818_s17, 4  ;;  %s743_s22 = int_to_ptr.vmem [resolvable:$false] %s742_s22 }
  0x21   : > { %s744_s23 = scalar_lea.vmem %s743_s22, 3072  ;;  %p745_p2 = scmp.lt.s32.totalorder %s907_s30, %s743_s22 }
  0x22   : > { %p740_p9 = pnand %p738_p10, %p726_p1  ;;  %p746_p12 = scmp.lt.s32.totalorder %s744_s23, %s737_s16 }
  0x24   : > { %p741_p0 = pneg %p740_p9  ;;  %p747_p11 = por %p746_p12, %p745_p2 }
  0x26   : > { %p748_p6 = pnand %p747_p11, %p741_p0 }
  0x28   : > { %751 = shalt.err (!%p748_p6)
}
  0x29   : > { %s819_s24 = smov 128   ;;  %s820_s25 = smov 8  }
  0x2a   : > { %678 = dma.hbm_to_vmem [thread:$0]  (!%p903_p13), %s901_s27, 1536, %s907_s30, %s909_s3, %s819_s24, %s819_s24, %s820_s25  }
  0x2b   : > { %p582_p9 = scmp.ge.s32.totalorder %s816_s12, 1  ;;  %p132_p1 = scmp.lt.s32.totalorder %s816_s12, 3 }
  0x2d   : > { %p133_p3 = pnand %p582_p9, %p132_p1 }
  0x2e   : > { %s933_s26 = sand.u32 (!%p133_p3), 1, %s808_s10   ;;  %p1158_p6 = scmp.ne.s32.totalorder (!%p133_p3), %s1154_s19, 0 }
  0x2f   : > { %136 = sbr.rel (%p133_p3) target bundleno = 563 (0x233), region = 28  ;;  %s139_s4 = scalar_lea.sflag (!%p133_p3), [#allocation4], %s933_s26 }
  0x30   : > { %s670_s29 = smul.u32 (!%p133_p3), 96, %s933_s26 }
  0x32   : > { %s937_s5 = scalar_lea.vmem (!%p133_p3), [#allocation3], %s670_s29 }
  0x34   : > { %795 = dma.done.wait (%p1158_p6), %s139_s4, 1536  }
  0x35   : > { %797 = vsyncadd (%p1158_p6), %s139_s4, 4294965760  ;;  %v586_v0 = vld [vmem:[%s937_s5 + $0x28] sm:$0xff]  ;;  %v585_v1 = vld [vmem:[%s937_s5 + $0x20] sm:$0xff]  ;;  %s821_s27 = smov 32   ;;  %vm168_vm0 = vcmask 261120   ;;  %s822_s19 = smov 64  }
  0x36   : > { %183 = vrot.lane.b32.xlu0 %v586_v0, %s821_s27  ;;  %181 = vrot.lane.b32.xlu1 %v585_v1, %s821_s27  ;;  %v589_v2 = vld [vmem:[%s937_s5 + $0x40] sm:$0xff]  ;;  %v592_v3 = vld [vmem:[%s937_s5 + $0x58] sm:$0xff]  ;;  %s823_s28 = smov 96   ;;  %vm243_vm1 = vcmask 195584   ;;  %vm188_vm2 = vcmask 523520   ;;  %vm208_vm3 = vcmask 785920  }
  0x37   : > { %v167_v4 = vld [vmem:[%s937_s5 + $0x10] sm:$0xff]  ;;  %v166_v5 = vld [vmem:[%s937_s5 + $0x8] sm:$0xff]  ;;  %v165_v6 = vld [vmem:[%s937_s5] sm:$0xff]  ;;  %vm228_vm4 = vcmask 1048320   ;;  %s583_s3 = sshll.u32 %s933_s26, 6  ;;  %p1159_p12 = scmp.ne.s32.totalorder %s1155_s20, 0 }
  0x38   : > { %171 = vst.msk [vmem:[#allocation2 + $0x10] sm:$0xff] %vm168_vm0, %v167_v4  ;;  %170 = vst.msk [vmem:[#allocation2 + $0x8] sm:$0xff] %vm168_vm0, %v166_v5  ;;  %v588_v7 = vld [vmem:[%s937_s5 + $0x38] sm:$0xff]  ;;  %v591_v9 = vld [vmem:[%s937_s5 + $0x50] sm:$0xff]  ;;  %s1009_s6 = scalar_lea.vmem [#allocation6], %s583_s3  ;;  %s824_s16 = smov [#allocation6]  }
  0x39   : > { %169 = vst.msk [vmem:[#allocation2] sm:$0xff] %vm168_vm0, %v165_v6  ;;  %v584_v8 = vld [vmem:[%s937_s5 + $0x18] sm:$0xff]  ;;  %v587_v10 = vld [vmem:[%s937_s5 + $0x30] sm:$0xff]  ;;  %v232_v11 = vld [vmem:[%s1149_s0] sm:$0xff]  ;;  %s756_s17 = sshll.u32 %s824_s16, 4  ;;  %s757_s17 = int_to_ptr.vmem [resolvable:$false] %s756_s17 }
  0x3a   : > { %203 = vrot.lane.b32.xlu0 %v589_v2, %s822_s19  ;;  %223 = vrot.lane.b32.xlu1 %v592_v3, %s823_s28  ;;  %v590_v12 = vld [vmem:[%s937_s5 + $0x48] sm:$0xff]  ;;  %v233_v26 = vld [vmem:[%s1149_s0 + $0x8] sm:$0xff]  ;;  %s758_s22 = scalar_lea.vmem %s757_s17, 2048 }
  0x3b   : > { %650 = vmatprep.mubr.msk.f32.mxu0 %vm243_vm1, %v232_v11  ;;  %v236_v13 = vld [vmem:[%s1149_s0 + $0x20] sm:$0xff]  ;;  %v237_v27 = vld [vmem:[%s1149_s0 + $0x28] sm:$0xff]  ;;  %v234_v28 = vld [vmem:[%s1149_s0 + $0x10] sm:$0xff] }
  0x3c   : > { %656 = vmatprep.mubr.msk.f32.mxu1 %vm243_vm1, %v236_v13  ;;  %v238_v29 = vld [vmem:[%s1149_s0 + $0x30] sm:$0xff]  ;;  %v235_v30 = vld [vmem:[%s1149_s0 + $0x18] sm:$0xff] }
  0x3d   : > { %v239_v31 = vld [vmem:[%s1149_s0 + $0x38] sm:$0xff] }
  0x3e   : > { %201 = vrot.lane.b32.xlu0 %v588_v7, %s822_s19  ;;  %179 = vrot.lane.b32.xlu1 %v584_v8, %s821_s27 }
  0x42   : > { %221 = vrot.lane.b32.xlu0 %v591_v9, %s823_s28  ;;  %199 = vrot.lane.b32.xlu1 %v587_v10, %s822_s19 }
  0x46   : > { %219 = vrot.lane.b32.xlu0 %v590_v12, %s823_s28 }
  0xa8   : > { %v184_v14 = vpop.permute.xlu0 %183  ;;  %v182_v15 = vpop.permute.xlu1 %181 }
  0xa9   : > { %191 = vst.msk [vmem:[#allocation2 + $0x10] sm:$0xff] %vm188_vm2, %v184_v14  ;;  %190 = vst.msk [vmem:[#allocation2 + $0x8] sm:$0xff] %vm188_vm2, %v182_v15 }
  0xac   : > { %v204_v16 = vpop.permute.xlu0 %203  ;;  %v224_v17 = vpop.permute.xlu1 %223 }
  0xad   : > { %211 = vst.msk [vmem:[#allocation2 + $0x10] sm:$0xff] %vm208_vm3, %v204_v16 }
  0xae   : > { %231 = vst.msk [vmem:[#allocation2 + $0x10] sm:$0xff] %vm228_vm4, %v224_v17 }
  0xb0   : > { %v202_v18 = vpop.permute.xlu0 %201  ;;  %v180_v19 = vpop.permute.xlu1 %179 }
  0xb1   : > { %210 = vst.msk [vmem:[#allocation2 + $0x8] sm:$0xff] %vm208_vm3, %v202_v18 }
  0xb2   : > { %189 = vst.msk [vmem:[#allocation2] sm:$0xff] %vm188_vm2, %v180_v19 }
  0xb4   : > { %v222_v20 = vpop.permute.xlu0 %221  ;;  %v200_v21 = vpop.permute.xlu1 %199 }
  0xb5   : > { %230 = vst.msk [vmem:[#allocation2 + $0x8] sm:$0xff] %vm228_vm4, %v222_v20  ;;  %v242_v22 = vld [vmem:[#allocation2 + $0x10] sm:$0xff] }
  0xb6   : > { %209 = vst.msk [vmem:[#allocation2] sm:$0xff] %vm208_vm3, %v200_v21  ;;  %644 = vmatprep.subr.mxu0 %v242_v22  ;;  %662 = vmatprep.subr.mxu1 %v242_v22 }
  0xb7   : > { %645 = vmatpush3.msra.mxu0 %v242_v22  ;;  %665 = vmatpush3.msra.mxu1 %v242_v22 }
  0xb8   : > { %v220_v23 = vpop.permute.xlu0 %219 }
  0xb9   : > { %229 = vst.msk [vmem:[#allocation2] sm:$0xff] %vm228_vm4, %v220_v23 }
  0xbc   : > { %v241_v24 = vld [vmem:[#allocation2 + $0x8] sm:$0xff] }
  0xbd   : > { %646 = vmatprep.subr.mxu0 %v241_v24  ;;  %663 = vmatprep.subr.mxu1 %v241_v24 }
  0xbe   : > { %647 = vmatpush3.msra.mxu0 %v241_v24  ;;  %666 = vmatpush3.msra.mxu1 %v241_v24 }
  0xc0   : > { %v240_v25 = vld [vmem:[#allocation2] sm:$0xff] }
  0xc1   : > { %648 = vmatprep.subr.mxu0 %v240_v25  ;;  %664 = vmatprep.subr.mxu1 %v240_v25 }
  0xc2   : > { %649 = vmatpush3.msra.mxu0 %v240_v25  ;;  %667 = vmatpush3.msra.mxu1 %v240_v25 }
  0xc3   : > { %651 = vmatmul.mubr.msk.f32.vlgmr.msra.gmra.mxu0 %vm243_vm1, %v233_v26  ;;  %657 = vmatmul.mubr.msk.f32.vlgmr.msra.gmra.mxu1 %vm243_vm1, %v237_v27 }
  0xc4   : > { %653 = vmatprep.mubr.msk.f32.mxu0 %vm243_vm1, %v234_v28  ;;  %659 = vmatprep.mubr.msk.f32.mxu1 %vm243_vm1, %v238_v29 }
  0xc7   : > { %654 = vmatmul.mubr.msk.f32.gmra.mxu0 %vm243_vm1, %v235_v30  ;;  %660 = vmatmul.mubr.msk.f32.gmra.mxu1 %vm243_vm1, %v239_v31 }
 0x183   : > { %v652_v32 = vpop.f32.mrf.mxu0  ;;  %v658_v34 = vpop.f32.mrf.mxu1 }
 0x184   : > { %374 = vst.msk [vmem:[%s1009_s6 + $0x8] sm:$0xff] %vm168_vm0, %v652_v32  ;;  %379 = vrot.lane.b32.xlu0 %v652_v32, %s823_s28 }
 0x185   : > { %v334_v33 = vpop.f32.mrf.mxu0  ;;  %v354_v35 = vpop.f32.mrf.mxu1 }
 0x186   : > { %373 = vst.msk [vmem:[%s1009_s6] sm:$0xff] %vm168_vm0, %v334_v33  ;;  %377 = vrot.lane.b32.xlu1 %v334_v33, %s823_s28 }
 0x187   : > { %v655_v36 = vpop.f32.mrf.mxu0  ;;  %v661_v38 = vpop.f32.mrf.mxu1 }
 0x188   : > { %388 = vrot.lane.b32.xlu0 %v652_v32, %s822_s19 }
 0x189   : > { %v344_v37 = vpop.f32.mrf.mxu0  ;;  %v364_v39 = vpop.f32.mrf.mxu1 }
 0x18a   : > { %386 = vrot.lane.b32.xlu1 %v334_v33, %s822_s19 }
 0x18c   : > { %397 = vrot.lane.b32.xlu0 %v652_v32, %s821_s27 }
 0x18e   : > { %395 = vrot.lane.b32.xlu1 %v334_v33, %s821_s27 }
 0x190   : > { %436 = vrot.lane.b32.xlu0 %v658_v34, %s822_s19 }
 0x192   : > { %434 = vrot.lane.b32.xlu1 %v354_v35, %s822_s19 }
 0x194   : > { %444 = vrot.lane.b32.xlu0 %v658_v34, %s821_s27 }
 0x196   : > { %442 = vrot.lane.b32.xlu1 %v354_v35, %s821_s27 }
 0x198   : > { %454 = vrot.lane.b32.xlu0 %v658_v34, %s823_s28 }
 0x19a   : > { %452 = vrot.lane.b32.xlu1 %v354_v35, %s823_s28 }
 0x19c   : > { %408 = vrot.lane.b32.xlu0 %v655_v36, %s821_s27 }
 0x19e   : > { %406 = vrot.lane.b32.xlu1 %v344_v37, %s821_s27 }
 0x1a0   : > { %418 = vrot.lane.b32.xlu0 %v655_v36, %s823_s28 }
 0x1a2   : > { %416 = vrot.lane.b32.xlu1 %v344_v37, %s823_s28 }
 0x1a4   : > { %426 = vrot.lane.b32.xlu0 %v655_v36, %s822_s19 }
 0x1a6   : > { %424 = vrot.lane.b32.xlu1 %v344_v37, %s822_s19 }
 0x1a8   : > { %464 = vrot.lane.b32.xlu0 %v661_v38, %s823_s28 }
 0x1aa   : > { %462 = vrot.lane.b32.xlu1 %v364_v39, %s823_s28 }
 0x1ac   : > { %472 = vrot.lane.b32.xlu0 %v661_v38, %s822_s19 }
 0x1ae   : > { %470 = vrot.lane.b32.xlu1 %v364_v39, %s822_s19  ;;  %s503_s19 = sshll.u32 %s1009_s6, 4  ;;  %s1102_s19 = int_to_ptr.vmem [resolvable:$true] %s503_s19 }
 0x1af   : > { %s752_s14 = scalar_lea.vmem %s1102_s19, 1024  ;;  %p759_p5 = scmp.lt.s32.totalorder %s1102_s19, %s757_s17 }
 0x1b0   : > { %480 = vrot.lane.b32.xlu0 %v661_v38, %s821_s27  ;;  %p753_p11 = scmp.ne.s32.totalorder %s1102_s19, %s752_s14  ;;  %p760_p7 = scmp.lt.s32.totalorder %s758_s22, %s752_s14 }
 0x1b2   : > { %478 = vrot.lane.b32.xlu1 %v364_v39, %s821_s27  ;;  %s632_s27 = sshll.u32 %s863_s13, 10  ;;  %s489_s13 = scalar_lea.sflag [#allocation5], %s933_s26 }
 0x1b3   : > { %s1100_s8 = scalar_lea.hbm %s1151_s2, %s632_s27  ;;  %p754_p13 = pnand %p753_p11, %p1159_p12 }
 0x1b4   : > { %p761_p8 = por %p760_p7, %p759_p5 }
 0x1b5   : > { %p755_p4 = pneg %p754_p13 }
 0x1b7   : > { %p762_p10 = pnand %p761_p8, %p755_p4 }
 0x1f6   : > { %v380_v40 = vpop.permute.xlu0 %379 }
 0x1f7   : > { %602 = vst.msk [vmem:[%s1009_s6 + $0x18] sm:$0xff] %vm168_vm0, %v380_v40 }
 0x1f8   : > { %608 = vst.msk [vmem:[%s1009_s6 + $0x18] sm:$0xff] %vm188_vm2, %v655_v36  ;;  %v378_v41 = vpop.permute.xlu1 %377 }
 0x1f9   : > { %601 = vst.msk [vmem:[%s1009_s6 + $0x10] sm:$0xff] %vm168_vm0, %v378_v41 }
 0x1fa   : > { %607 = vst.msk [vmem:[%s1009_s6 + $0x10] sm:$0xff] %vm188_vm2, %v344_v37  ;;  %v389_v42 = vpop.permute.xlu0 %388 }
 0x1fb   : > { %604 = vst.msk [vmem:[%s1009_s6 + $0x28] sm:$0xff] %vm168_vm0, %v389_v42 }
 0x1fc   : > { %v387_v43 = vpop.permute.xlu1 %386 }
 0x1fd   : > { %603 = vst.msk [vmem:[%s1009_s6 + $0x20] sm:$0xff] %vm168_vm0, %v387_v43 }
 0x1fe   : > { %v398_v44 = vpop.permute.xlu0 %397 }
 0x1ff   : > { %606 = vst.msk [vmem:[%s1009_s6 + $0x38] sm:$0xff] %vm168_vm0, %v398_v44 }
 0x200   : > { %v396_v45 = vpop.permute.xlu1 %395 }
 0x201   : > { %605 = vst.msk [vmem:[%s1009_s6 + $0x30] sm:$0xff] %vm168_vm0, %v396_v45 }
 0x202   : > { %v437_v46 = vpop.permute.xlu0 %436 }
 0x204   : > { %v435_v47 = vpop.permute.xlu1 %434 }
 0x206   : > { %v445_v48 = vpop.permute.xlu0 %444 }
 0x207   : > { %614 = vst.msk [vmem:[%s1009_s6 + $0x18] sm:$0xff] %vm208_vm3, %v445_v48 }
 0x208   : > { %v443_v49 = vpop.permute.xlu1 %442 }
 0x209   : > { %613 = vst.msk [vmem:[%s1009_s6 + $0x10] sm:$0xff] %vm208_vm3, %v443_v49 }
 0x20a   : > { %v455_v50 = vpop.permute.xlu0 %454 }
 0x20c   : > { %v453_v51 = vpop.permute.xlu1 %452 }
 0x20e   : > { %v409_v52 = vpop.permute.xlu0 %408 }
 0x20f   : > { %413 = vst.msk [vmem:[%s1009_s6 + $0x8] sm:$0xff] %vm188_vm2, %v409_v52 }
 0x210   : > { %441 = vst.msk [vmem:[%s1009_s6 + $0x8] sm:$0xff] %vm208_vm3, %v437_v46  ;;  %v407_v53 = vpop.permute.xlu1 %406 }
 0x211   : > { %412 = vst.msk [vmem:[%s1009_s6] sm:$0xff] %vm188_vm2, %v407_v53 }
 0x212   : > { %440 = vst.msk [vmem:[%s1009_s6] sm:$0xff] %vm208_vm3, %v435_v47  ;;  %v419_v54 = vpop.permute.xlu0 %418 }
 0x213   : > { %610 = vst.msk [vmem:[%s1009_s6 + $0x28] sm:$0xff] %vm188_vm2, %v419_v54 }
 0x214   : > { %616 = vst.msk [vmem:[%s1009_s6 + $0x28] sm:$0xff] %vm208_vm3, %v658_v34  ;;  %v417_v55 = vpop.permute.xlu1 %416 }
 0x215   : > { %609 = vst.msk [vmem:[%s1009_s6 + $0x20] sm:$0xff] %vm188_vm2, %v417_v55 }
 0x216   : > { %615 = vst.msk [vmem:[%s1009_s6 + $0x20] sm:$0xff] %vm208_vm3, %v354_v35  ;;  %v427_v56 = vpop.permute.xlu0 %426 }
 0x217   : > { %612 = vst.msk [vmem:[%s1009_s6 + $0x38] sm:$0xff] %vm188_vm2, %v427_v56 }
 0x218   : > { %618 = vst.msk [vmem:[%s1009_s6 + $0x38] sm:$0xff] %vm208_vm3, %v455_v50  ;;  %v425_v57 = vpop.permute.xlu1 %424 }
 0x219   : > { %624 = vst.msk [vmem:[%s1009_s6 + $0x38] sm:$0xff] %vm228_vm4, %v661_v38 }
 0x21a   : > { %611 = vst.msk [vmem:[%s1009_s6 + $0x30] sm:$0xff] %vm188_vm2, %v425_v57  ;;  %v465_v58 = vpop.permute.xlu0 %464 }
 0x21b   : > { %617 = vst.msk [vmem:[%s1009_s6 + $0x30] sm:$0xff] %vm208_vm3, %v453_v51 }
 0x21c   : > { %623 = vst.msk [vmem:[%s1009_s6 + $0x30] sm:$0xff] %vm228_vm4, %v364_v39  ;;  %469 = vst.msk [vmem:[%s1009_s6 + $0x8] sm:$0xff] %vm228_vm4, %v465_v58  ;;  %v463_v59 = vpop.permute.xlu1 %462 }
 0x21d   : > { %468 = vst.msk [vmem:[%s1009_s6] sm:$0xff] %vm228_vm4, %v463_v59 }
 0x21e   : > { %v473_v60 = vpop.permute.xlu0 %472 }
 0x21f   : > { %620 = vst.msk [vmem:[%s1009_s6 + $0x18] sm:$0xff] %vm228_vm4, %v473_v60 }
 0x220   : > { %v471_v61 = vpop.permute.xlu1 %470 }
 0x221   : > { %619 = vst.msk [vmem:[%s1009_s6 + $0x10] sm:$0xff] %vm228_vm4, %v471_v61 }
 0x222   : > { %v481_v62 = vpop.permute.xlu0 %480 }
 0x223   : > { %622 = vst.msk [vmem:[%s1009_s6 + $0x28] sm:$0xff] %vm228_vm4, %v481_v62 }
 0x224   : > { %v479_v63 = vpop.permute.xlu1 %478 }
 0x225   : > { %621 = vst.msk [vmem:[%s1009_s6 + $0x20] sm:$0xff] %vm228_vm4, %v479_v63 }
 0x226   : > { %765 = shalt.err (!%p762_p10)
}
 0x227   : > { %s766_s23 = scalar_lea.hbm %s1100_s8, 1024  ;;  %s770_s29 = scalar_lea.hbm %s1151_s2, 2048 }
 0x228   : > { %p767_p0 = scmp.ne.s32.totalorder %s1100_s8, %s766_s23  ;;  %p771_p1 = scmp.lt.s32.totalorder %s1100_s8, %s1151_s2 }
 0x229   : > { %p772_p3 = scmp.lt.s32.totalorder %s770_s29, %s766_s23 }
 0x22a   : > { %p768_p2 = pnand %p767_p0, %p1159_p12 }
 0x22b   : > { %p773_p6 = por %p772_p3, %p771_p1 }
 0x22c   : > { %p769_p9 = pneg %p768_p2 }
 0x22e   : > { %p774_p11 = pnand %p773_p6, %p769_p9 }
 0x230   : > { %777 = shalt.err (!%p774_p11)
}
 0x231   : > { %s825_s30 = smov 128   ;;  %s826_s3 = smov 8  }
 0x232   : > { %673 = dma.vmem_to_hbm [thread:$0]  (%p1159_p12), %s1102_s19, 1024, %s1100_s8, %s489_s13, %s825_s30, %s825_s30, %s826_s3  }
 0x233 PF: > { %s518_s6 = sand.u32 1, %s804_s9   ;;  %p1160_p13 = scmp.ne.s32.totalorder %s1156_s21, 0 }
 0x234   : > { %p1161_p4 = scmp.ge.s32.totalorder %s816_s12, 2  ;;  %s519_s27 = scalar_lea.sflag [#allocation5], %s518_s6 }
 0x236   : > { %p680_p5 = pnand %p1161_p4, %p1160_p13 }
 0x238   : > { %p681_p7 = pneg %p680_p5 }
 0x23a   : > { %799 = dma.done.wait (%p681_p7), %s519_s27, 1024  }
 0x23b   : > { %801 = vsyncadd (%p681_p7), %s519_s27, 4294966272  ;;  %p15_p8 = scmp.ge.s32.totalorder %s867_s15, 4   ;;  %s1162_s9 = smov %s808_s10 }
 0x23c   : > { %s1163_s10 = smov %s812_s11  ;;  %s1164_s11 = smov %s879_s18 }
 0x23d   : > { %s1165_s12 = smov %s867_s15  ;;  %17 = sbr.rel (!%p15_p8) target bundleno = 5 (0x5), region = 79 }
 0x242   :  { %524 = vsyncpa [#allocation4], 1 }
 0x243   :  { %526 = vsyncpa [#allocation4 + $0x1], 1 }
 0x244   :  { %527 = vsyncpa [#allocation5], 1 }
 0x245   :  { %529 = vsyncpa [#allocation5 + $0x1], 1 }

// kernel: tpu_custom_call.1
= control target key start
LH: loop header
LB: loop body
LE: loop exit
PB: predicated region body
PF: predicated region fallthrough
CT: control target
= control target key end

     0   :  { %7 = vsyncpa [#allocation4], 0  ;;  %s1149_s0 = inlined_call_operand.vmem [shape: f32[64,24], index: 0, kind: input, shape index: {}]   ;;  %s1150_s1 = inlined_call_operand.hbm [shape: f32[8,24,32], index: 1, kind: input, shape index: {}]   ;;  %s1151_s2 = inlined_call_operand.hbm [shape: f32[8,16,128], index: 2, kind: output, shape index: {}]  }
   0x1   :  { %9 = vsyncpa [#allocation4 + $0x1], 0 }
   0x2   :  { %10 = vsyncpa [#allocation5], 0 }
   0x3   :  { %12 = vsyncpa [#allocation5 + $0x1], 0  ;;  %s842_s9 = smov 0   ;;  %s844_s10 = smov 0  }
   0x4   :  { %s846_s11 = smov 0   ;;  %s848_s12 = smov 0  }
   0x5 LB: > { %s863_s13 = sadd.s32 4294967295, %s816_s12   ;;  %s576_s14 = sadd.s32 4294967294, %s816_s12   ;;  %s816_s12 = sphi %s848_s12, %s1165_s12   ;;  %s812_s11 = sphi %s846_s11, %s1164_s11   ;;  %s808_s10 = sphi %s844_s10, %s1163_s10   ;;  %s804_s9 = sphi %s842_s9, %s1162_s9  }
   0x6   : > { %s867_s15 = sadd.s32 1, %s816_s12   ;;  %s46_s16 = sadd.s32 1, %s812_s11 }
   0x7   : > { %s43_s17 = ssub.s32 %s816_s12, %s867_s15  ;;  %p53_p0 = scmp.ne.s32.totalorder %s812_s11, %s808_s10 }
   0x8   : > { %p44_p1 = scmp.eq.s32.totalorder %s43_s17, 0  ;;  %p54_p2 = scmp.eq.s32.totalorder %s816_s12, 0 }
   0x9   : > { %p59_p3 = scmp.ne.s32.totalorder %s808_s10, %s804_s9  ;;  %p60_p4 = scmp.eq.s32.totalorder %s863_s13, 0 }
   0xa   : > { %s879_s18 = scalar_select %p44_p1, %s812_s11, %s46_s16  }
   0xb   : > { %p55_p5 = por %p54_p2, %p53_p0  ;;  %p881_p6 = por %p60_p4, %p59_p3 }
   0xc   : > { %p83_p7 = scmp.eq.s32.totalorder %s863_s13, 1  ;;  %p89_p8 = scmp.eq.s32.totalorder %s576_s14, 1 }
   0xd   : > { %s1154_s19 = scalar_select %p881_p6, 1, 0 }
   0xe   : > { %p683_p10 = scmp.lt.s32.totalorder %s816_s12, 2  ;;  %p888_p11 = por %p83_p7, %p53_p0 }
   0xf   : > { %p892_p12 = por %p89_p8, %p59_p3  ;;  %s112_s22 = sand.u32 1, %s812_s11  }
  0x10   : > { %s1155_s20 = scalar_select %p888_p11, 1, 0 }
  0x11   : > { %s1156_s21 = scalar_select %p892_p12, 1, 0 }
  0x12   : > { %s669_s23 = smul.u32 1536, %s816_s12  ;;  %p903_p13 = pnand %p683_p10, %p55_p5 }
  0x13   : > { %s668_s24 = smul.u32 96, %s112_s22  ;;  %s909_s3 = scalar_lea.sflag [#allocation4], %s112_s22 }
  0x14   : > { %s901_s27 = scalar_lea.hbm %s1150_s1, %s669_s23  ;;  %p726_p1 = pneg %p903_p13 }
  0x15   : > { %s116_s29 = scalar_lea.vmem [#allocation3], %s668_s24  ;;  %s724_s4 = scalar_lea.hbm %s901_s27, 1536 }
  0x16   : > { %s124_s30 = sshll.u32 %s116_s29, 4  ;;  %p725_p0 = scmp.ne.s32.totalorder %s901_s27, %s724_s4  ;;  %s907_s30 = int_to_ptr.vmem [resolvable:$true] %s124_s30 }
  0x17   : > { %s729_s7 = scalar_lea.hbm %s1150_s1, 3072  ;;  %p730_p4 = scmp.lt.s32.totalorder %s901_s27, %s1150_s1 }
  0x18   : > { %p727_p2 = pnand %p726_p1, %p725_p0  ;;  %p731_p5 = scmp.lt.s32.totalorder %s729_s7, %s724_s4 }
  0x1a   : > { %p728_p3 = pneg %p727_p2  ;;  %p732_p7 = por %p731_p5, %p730_p4 }
  0x1c   : > { %p733_p8 = pnand %p732_p7, %p728_p3 }
  0x1e   : > { %736 = shalt.err (!%p733_p8)
}
  0x1f   : > { %s737_s16 = scalar_lea.vmem %s907_s30, 1536  ;;  %s818_s17 = smov [#allocation3]  }
  0x20   : > { %p738_p10 = scmp.ne.s32.totalorder %s907_s30, %s737_s16  ;;  %s742_s22 = sshll.u32 %s818_s17, 4  ;;  %s743_s22 = int_to_ptr.vmem [resolvable:$false] %s742_s22 }
  0x21   : > { %s744_s23 = scalar_lea.vmem %s743_s22, 3072  ;;  %p745_p2 = scmp.lt.s32.totalorder %s907_s30, %s743_s22 }
  0x22   : > { %p740_p9 = pnand %p738_p10, %p726_p1  ;;  %p746_p12 = scmp.lt.s32.totalorder %s744_s23, %s737_s16 }
  0x24   : > { %p741_p0 = pneg %p740_p9  ;;  %p747_p11 = por %p746_p12, %p745_p2 }
  0x26   : > { %p748_p6 = pnand %p747_p11, %p741_p0 }
  0x28   : > { %751 = shalt.err (!%p748_p6)
}
  0x29   : > { %s819_s24 = smov 128   ;;  %s820_s25 = smov 8  }
  0x2a   : > { %678 = dma.hbm_to_vmem [thread:$0]  (!%p903_p13), %s901_s27, 1536, %s907_s30, %s909_s3, %s819_s24, %s819_s24, %s820_s25  }
  0x2b   : > { %p582_p9 = scmp.ge.s32.totalorder %s816_s12, 1  ;;  %p132_p1 = scmp.lt.s32.totalorder %s816_s12, 3 }
  0x2d   : > { %p133_p3 = pnand %p582_p9, %p132_p1 }
  0x2e   : > { %s933_s26 = sand.u32 (!%p133_p3), 1, %s808_s10   ;;  %p1158_p6 = scmp.ne.s32.totalorder (!%p133_p3), %s1154_s19, 0 }
  0x2f   : > { %136 = sbr.rel (%p133_p3) target bundleno = 563 (0x233), region = 28  ;;  %s139_s4 = scalar_lea.sflag (!%p133_p3), [#allocation4], %s933_s26 }
  0x30   : > { %s670_s29 = smul.u32 (!%p133_p3), 96, %s933_s26 }
  0x32   : > { %s937_s5 = scalar_lea.vmem (!%p133_p3), [#allocation3], %s670_s29 }
  0x34   : > { %795 = dma.done.wait (%p1158_p6), %s139_s4, 1536  }
  0x35   : > { %797 = vsyncadd (%p1158_p6), %s139_s4, 4294965760  ;;  %v586_v0 = vld [vmem:[%s937_s5 + $0x28] sm:$0xff]  ;;  %v585_v1 = vld [vmem:[%s937_s5 + $0x20] sm:$0xff]  ;;  %s821_s27 = smov 32   ;;  %vm168_vm0 = vcmask 261120   ;;  %s822_s19 = smov 64  }
  0x36   : > { %183 = vrot.lane.b32.xlu0 %v586_v0, %s821_s27  ;;  %181 = vrot.lane.b32.xlu1 %v585_v1, %s821_s27  ;;  %v589_v2 = vld [vmem:[%s937_s5 + $0x40] sm:$0xff]  ;;  %v592_v3 = vld [vmem:[%s937_s5 + $0x58] sm:$0xff]  ;;  %s823_s28 = smov 96   ;;  %vm243_vm1 = vcmask 195584   ;;  %vm188_vm2 = vcmask 523520   ;;  %vm208_vm3 = vcmask 785920  }
  0x37   : > { %v167_v4 = vld [vmem:[%s937_s5 + $0x10] sm:$0xff]  ;;  %v166_v5 = vld [vmem:[%s937_s5 + $0x8] sm:$0xff]  ;;  %v165_v6 = vld [vmem:[%s937_s5] sm:$0xff]  ;;  %vm228_vm4 = vcmask 1048320   ;;  %s583_s3 = sshll.u32 %s933_s26, 6  ;;  %p1159_p12 = scmp.ne.s32.totalorder %s1155_s20, 0 }
  0x38   : > { %171 = vst.msk [vmem:[#allocation2 + $0x10] sm:$0xff] %vm168_vm0, %v167_v4  ;;  %170 = vst.msk [vmem:[#allocation2 + $0x8] sm:$0xff] %vm168_vm0, %v166_v5  ;;  %v588_v7 = vld [vmem:[%s937_s5 + $0x38] sm:$0xff]  ;;  %v591_v9 = vld [vmem:[%s937_s5 + $0x50] sm:$0xff]  ;;  %s1009_s6 = scalar_lea.vmem [#allocation6], %s583_s3  ;;  %s824_s16 = smov [#allocation6]  }
  0x39   : > { %169 = vst.msk [vmem:[#allocation2] sm:$0xff] %vm168_vm0, %v165_v6  ;;  %v584_v8 = vld [vmem:[%s937_s5 + $0x18] sm:$0xff]  ;;  %v587_v10 = vld [vmem:[%s937_s5 + $0x30] sm:$0xff]  ;;  %v232_v11 = vld [vmem:[%s1149_s0] sm:$0xff]  ;;  %s756_s17 = sshll.u32 %s824_s16, 4  ;;  %s757_s17 = int_to_ptr.vmem [resolvable:$false] %s756_s17 }
  0x3a   : > { %203 = vrot.lane.b32.xlu0 %v589_v2, %s822_s19  ;;  %223 = vrot.lane.b32.xlu1 %v592_v3, %s823_s28  ;;  %v590_v12 = vld [vmem:[%s937_s5 + $0x48] sm:$0xff]  ;;  %v233_v26 = vld [vmem:[%s1149_s0 + $0x8] sm:$0xff]  ;;  %s758_s22 = scalar_lea.vmem %s757_s17, 2048 }
  0x3b   : > { %650 = vmatprep.mubr.msk.f32.mxu0 %vm243_vm1, %v232_v11  ;;  %v236_v13 = vld [vmem:[%s1149_s0 + $0x20] sm:$0xff]  ;;  %v237_v27 = vld [vmem:[%s1149_s0 + $0x28] sm:$0xff]  ;;  %v234_v28 = vld [vmem:[%s1149_s0 + $0x10] sm:$0xff] }
  0x3c   : > { %656 = vmatprep.mubr.msk.f32.mxu1 %vm243_vm1, %v236_v13  ;;  %v238_v29 = vld [vmem:[%s1149_s0 + $0x30] sm:$0xff]  ;;  %v235_v30 = vld [vmem:[%s1149_s0 + $0x18] sm:$0xff] }
  0x3d   : > { %v239_v31 = vld [vmem:[%s1149_s0 + $0x38] sm:$0xff] }
  0x3e   : > { %201 = vrot.lane.b32.xlu0 %v588_v7, %s822_s19  ;;  %179 = vrot.lane.b32.xlu1 %v584_v8, %s821_s27 }
  0x42   : > { %221 = vrot.lane.b32.xlu0 %v591_v9, %s823_s28  ;;  %199 = vrot.lane.b32.xlu1 %v587_v10, %s822_s19 }
  0x46   : > { %219 = vrot.lane.b32.xlu0 %v590_v12, %s823_s28 }
  0xa8   : > { %v184_v14 = vpop.permute.xlu0 %183  ;;  %v182_v15 = vpop.permute.xlu1 %181 }
  0xa9   : > { %191 = vst.msk [vmem:[#allocation2 + $0x10] sm:$0xff] %vm188_vm2, %v184_v14  ;;  %190 = vst.msk [vmem:[#allocation2 + $0x8] sm:$0xff] %vm188_vm2, %v182_v15 }
  0xac   : > { %v204_v16 = vpop.permute.xlu0 %203  ;;  %v224_v17 = vpop.permute.xlu1 %223 }
  0xad   : > { %211 = vst.msk [vmem:[#allocation2 + $0x10] sm:$0xff] %vm208_vm3, %v204_v16 }
  0xae   : > { %231 = vst.msk [vmem:[#allocation2 + $0x10] sm:$0xff] %vm228_vm4, %v224_v17 }
  0xb0   : > { %v202_v18 = vpop.permute.xlu0 %201  ;;  %v180_v19 = vpop.permute.xlu1 %179 }
  0xb1   : > { %210 = vst.msk [vmem:[#allocation2 + $0x8] sm:$0xff] %vm208_vm3, %v202_v18 }
  0xb2   : > { %189 = vst.msk [vmem:[#allocation2] sm:$0xff] %vm188_vm2, %v180_v19 }
  0xb4   : > { %v222_v20 = vpop.permute.xlu0 %221  ;;  %v200_v21 = vpop.permute.xlu1 %199 }
  0xb5   : > { %230 = vst.msk [vmem:[#allocation2 + $0x8] sm:$0xff] %vm228_vm4, %v222_v20  ;;  %v242_v22 = vld [vmem:[#allocation2 + $0x10] sm:$0xff] }
  0xb6   : > { %209 = vst.msk [vmem:[#allocation2] sm:$0xff] %vm208_vm3, %v200_v21  ;;  %644 = vmatprep.subr.mxu0 %v242_v22  ;;  %662 = vmatprep.subr.mxu1 %v242_v22 }
  0xb7   : > { %645 = vmatpush3.msra.mxu0 %v242_v22  ;;  %665 = vmatpush3.msra.mxu1 %v242_v22 }
  0xb8   : > { %v220_v23 = vpop.permute.xlu0 %219 }
  0xb9   : > { %229 = vst.msk [vmem:[#allocation2] sm:$0xff] %vm228_vm4, %v220_v23 }
  0xbc   : > { %v241_v24 = vld [vmem:[#allocation2 + $0x8] sm:$0xff] }
  0xbd   : > { %646 = vmatprep.subr.mxu0 %v241_v24  ;;  %663 = vmatprep.subr.mxu1 %v241_v24 }
  0xbe   : > { %647 = vmatpush3.msra.mxu0 %v241_v24  ;;  %666 = vmatpush3.msra.mxu1 %v241_v24 }
  0xc0   : > { %v240_v25 = vld [vmem:[#allocation2] sm:$0xff] }
  0xc1   : > { %648 = vmatprep.subr.mxu0 %v240_v25  ;;  %664 = vmatprep.subr.mxu1 %v240_v25 }
  0xc2   : > { %649 = vmatpush3.msra.mxu0 %v240_v25  ;;  %667 = vmatpush3.msra.mxu1 %v240_v25 }
  0xc3   : > { %651 = vmatmul.mubr.msk.f32.vlgmr.msra.gmra.mxu0 %vm243_vm1, %v233_v26  ;;  %657 = vmatmul.mubr.msk.f32.vlgmr.msra.gmra.mxu1 %vm243_vm1, %v237_v27 }
  0xc4   : > { %653 = vmatprep.mubr.msk.f32.mxu0 %vm243_vm1, %v234_v28  ;;  %659 = vmatprep.mubr.msk.f32.mxu1 %vm243_vm1, %v238_v29 }
  0xc7   : > { %654 = vmatmul.mubr.msk.f32.gmra.mxu0 %vm243_vm1, %v235_v30  ;;  %660 = vmatmul.mubr.msk.f32.gmra.mxu1 %vm243_vm1, %v239_v31 }
 0x183   : > { %v652_v32 = vpop.f32.mrf.mxu0  ;;  %v658_v34 = vpop.f32.mrf.mxu1 }
 0x184   : > { %374 = vst.msk [vmem:[%s1009_s6 + $0x8] sm:$0xff] %vm168_vm0, %v652_v32  ;;  %379 = vrot.lane.b32.xlu0 %v652_v32, %s823_s28 }
 0x185   : > { %v334_v33 = vpop.f32.mrf.mxu0  ;;  %v354_v35 = vpop.f32.mrf.mxu1 }
 0x186   : > { %373 = vst.msk [vmem:[%s1009_s6] sm:$0xff] %vm168_vm0, %v334_v33  ;;  %377 = vrot.lane.b32.xlu1 %v334_v33, %s823_s28 }
 0x187   : > { %v655_v36 = vpop.f32.mrf.mxu0  ;;  %v661_v38 = vpop.f32.mrf.mxu1 }
 0x188   : > { %388 = vrot.lane.b32.xlu0 %v652_v32, %s822_s19 }
 0x189   : > { %v344_v37 = vpop.f32.mrf.mxu0  ;;  %v364_v39 = vpop.f32.mrf.mxu1 }
 0x18a   : > { %386 = vrot.lane.b32.xlu1 %v334_v33, %s822_s19 }
 0x18c   : > { %397 = vrot.lane.b32.xlu0 %v652_v32, %s821_s27 }
 0x18e   : > { %395 = vrot.lane.b32.xlu1 %v334_v33, %s821_s27 }
 0x190   : > { %436 = vrot.lane.b32.xlu0 %v658_v34, %s822_s19 }
 0x192   : > { %434 = vrot.lane.b32.xlu1 %v354_v35, %s822_s19 }
 0x194   : > { %444 = vrot.lane.b32.xlu0 %v658_v34, %s821_s27 }
 0x196   : > { %442 = vrot.lane.b32.xlu1 %v354_v35, %s821_s27 }
 0x198   : > { %454 = vrot.lane.b32.xlu0 %v658_v34, %s823_s28 }
 0x19a   : > { %452 = vrot.lane.b32.xlu1 %v354_v35, %s823_s28 }
 0x19c   : > { %408 = vrot.lane.b32.xlu0 %v655_v36, %s821_s27 }
 0x19e   : > { %406 = vrot.lane.b32.xlu1 %v344_v37, %s821_s27 }
 0x1a0   : > { %418 = vrot.lane.b32.xlu0 %v655_v36, %s823_s28 }
 0x1a2   : > { %416 = vrot.lane.b32.xlu1 %v344_v37, %s823_s28 }
 0x1a4   : > { %426 = vrot.lane.b32.xlu0 %v655_v36, %s822_s19 }
 0x1a6   : > { %424 = vrot.lane.b32.xlu1 %v344_v37, %s822_s19 }
 0x1a8   : > { %464 = vrot.lane.b32.xlu0 %v661_v38, %s823_s28 }
 0x1aa   : > { %462 = vrot.lane.b32.xlu1 %v364_v39, %s823_s28 }
 0x1ac   : > { %472 = vrot.lane.b32.xlu0 %v661_v38, %s822_s19 }
 0x1ae   : > { %470 = vrot.lane.b32.xlu1 %v364_v39, %s822_s19  ;;  %s503_s19 = sshll.u32 %s1009_s6, 4  ;;  %s1102_s19 = int_to_ptr.vmem [resolvable:$true] %s503_s19 }
 0x1af   : > { %s752_s14 = scalar_lea.vmem %s1102_s19, 1024  ;;  %p759_p5 = scmp.lt.s32.totalorder %s1102_s19, %s757_s17 }
 0x1b0   : > { %480 = vrot.lane.b32.xlu0 %v661_v38, %s821_s27  ;;  %p753_p11 = scmp.ne.s32.totalorder %s1102_s19, %s752_s14  ;;  %p760_p7 = scmp.lt.s32.totalorder %s758_s22, %s752_s14 }
 0x1b2   : > { %478 = vrot.lane.b32.xlu1 %v364_v39, %s821_s27  ;;  %s632_s27 = sshll.u32 %s863_s13, 10  ;;  %s489_s13 = scalar_lea.sflag [#allocation5], %s933_s26 }
 0x1b3   : > { %s1100_s8 = scalar_lea.hbm %s1151_s2, %s632_s27  ;;  %p754_p13 = pnand %p753_p11, %p1159_p12 }
 0x1b4   : > { %p761_p8 = por %p760_p7, %p759_p5 }
 0x1b5   : > { %p755_p4 = pneg %p754_p13 }
 0x1b7   : > { %p762_p10 = pnand %p761_p8, %p755_p4 }
 0x1f6   : > { %v380_v40 = vpop.permute.xlu0 %379 }
 0x1f7   : > { %602 = vst.msk [vmem:[%s1009_s6 + $0x18] sm:$0xff] %vm168_vm0, %v380_v40 }
 0x1f8   : > { %608 = vst.msk [vmem:[%s1009_s6 + $0x18] sm:$0xff] %vm188_vm2, %v655_v36  ;;  %v378_v41 = vpop.permute.xlu1 %377 }
 0x1f9   : > { %601 = vst.msk [vmem:[%s1009_s6 + $0x10] sm:$0xff] %vm168_vm0, %v378_v41 }
 0x1fa   : > { %607 = vst.msk [vmem:[%s1009_s6 + $0x10] sm:$0xff] %vm188_vm2, %v344_v37  ;;  %v389_v42 = vpop.permute.xlu0 %388 }
 0x1fb   : > { %604 = vst.msk [vmem:[%s1009_s6 + $0x28] sm:$0xff] %vm168_vm0, %v389_v42 }
 0x1fc   : > { %v387_v43 = vpop.permute.xlu1 %386 }
 0x1fd   : > { %603 = vst.msk [vmem:[%s1009_s6 + $0x20] sm:$0xff] %vm168_vm0, %v387_v43 }
 0x1fe   : > { %v398_v44 = vpop.permute.xlu0 %397 }
 0x1ff   : > { %606 = vst.msk [vmem:[%s1009_s6 + $0x38] sm:$0xff] %vm168_vm0, %v398_v44 }
 0x200   : > { %v396_v45 = vpop.permute.xlu1 %395 }
 0x201   : > { %605 = vst.msk [vmem:[%s1009_s6 + $0x30] sm:$0xff] %vm168_vm0, %v396_v45 }
 0x202   : > { %v437_v46 = vpop.permute.xlu0 %436 }
 0x204   : > { %v435_v47 = vpop.permute.xlu1 %434 }
 0x206   : > { %v445_v48 = vpop.permute.xlu0 %444 }
 0x207   : > { %614 = vst.msk [vmem:[%s1009_s6 + $0x18] sm:$0xff] %vm208_vm3, %v445_v48 }
 0x208   : > { %v443_v49 = vpop.permute.xlu1 %442 }
 0x209   : > { %613 = vst.msk [vmem:[%s1009_s6 + $0x10] sm:$0xff] %vm208_vm3, %v443_v49 }
 0x20a   : > { %v455_v50 = vpop.permute.xlu0 %454 }
 0x20c   : > { %v453_v51 = vpop.permute.xlu1 %452 }
 0x20e   : > { %v409_v52 = vpop.permute.xlu0 %408 }
 0x20f   : > { %413 = vst.msk [vmem:[%s1009_s6 + $0x8] sm:$0xff] %vm188_vm2, %v409_v52 }
 0x210   : > { %441 = vst.msk [vmem:[%s1009_s6 + $0x8] sm:$0xff] %vm208_vm3, %v437_v46  ;;  %v407_v53 = vpop.permute.xlu1 %406 }
 0x211   : > { %412 = vst.msk [vmem:[%s1009_s6] sm:$0xff] %vm188_vm2, %v407_v53 }
 0x212   : > { %440 = vst.msk [vmem:[%s1009_s6] sm:$0xff] %vm208_vm3, %v435_v47  ;;  %v419_v54 = vpop.permute.xlu0 %418 }
 0x213   : > { %610 = vst.msk [vmem:[%s1009_s6 + $0x28] sm:$0xff] %vm188_vm2, %v419_v54 }
 0x214   : > { %616 = vst.msk [vmem:[%s1009_s6 + $0x28] sm:$0xff] %vm208_vm3, %v658_v34  ;;  %v417_v55 = vpop.permute.xlu1 %416 }
 0x215   : > { %609 = vst.msk [vmem:[%s1009_s6 + $0x20] sm:$0xff] %vm188_vm2, %v417_v55 }
 0x216   : > { %615 = vst.msk [vmem:[%s1009_s6 + $0x20] sm:$0xff] %vm208_vm3, %v354_v35  ;;  %v427_v56 = vpop.permute.xlu0 %426 }
 0x217   : > { %612 = vst.msk [vmem:[%s1009_s6 + $0x38] sm:$0xff] %vm188_vm2, %v427_v56 }
 0x218   : > { %618 = vst.msk [vmem:[%s1009_s6 + $0x38] sm:$0xff] %vm208_vm3, %v455_v50  ;;  %v425_v57 = vpop.permute.xlu1 %424 }
 0x219   : > { %624 = vst.msk [vmem:[%s1009_s6 + $0x38] sm:$0xff] %vm228_vm4, %v661_v38 }
 0x21a   : > { %611 = vst.msk [vmem:[%s1009_s6 + $0x30] sm:$0xff] %vm188_vm2, %v425_v57  ;;  %v465_v58 = vpop.permute.xlu0 %464 }
 0x21b   : > { %617 = vst.msk [vmem:[%s1009_s6 + $0x30] sm:$0xff] %vm208_vm3, %v453_v51 }
 0x21c   : > { %623 = vst.msk [vmem:[%s1009_s6 + $0x30] sm:$0xff] %vm228_vm4, %v364_v39  ;;  %469 = vst.msk [vmem:[%s1009_s6 + $0x8] sm:$0xff] %vm228_vm4, %v465_v58  ;;  %v463_v59 = vpop.permute.xlu1 %462 }
 0x21d   : > { %468 = vst.msk [vmem:[%s1009_s6] sm:$0xff] %vm228_vm4, %v463_v59 }
 0x21e   : > { %v473_v60 = vpop.permute.xlu0 %472 }
 0x21f   : > { %620 = vst.msk [vmem:[%s1009_s6 + $0x18] sm:$0xff] %vm228_vm4, %v473_v60 }
 0x220   : > { %v471_v61 = vpop.permute.xlu1 %470 }
 0x221   : > { %619 = vst.msk [vmem:[%s1009_s6 + $0x10] sm:$0xff] %vm228_vm4, %v471_v61 }
 0x222   : > { %v481_v62 = vpop.permute.xlu0 %480 }
 0x223   : > { %622 = vst.msk [vmem:[%s1009_s6 + $0x28] sm:$0xff] %vm228_vm4, %v481_v62 }
 0x224   : > { %v479_v63 = vpop.permute.xlu1 %478 }
 0x225   : > { %621 = vst.msk [vmem:[%s1009_s6 + $0x20] sm:$0xff] %vm228_vm4, %v479_v63 }
 0x226   : > { %765 = shalt.err (!%p762_p10)
}
 0x227   : > { %s766_s23 = scalar_lea.hbm %s1100_s8, 1024  ;;  %s770_s29 = scalar_lea.hbm %s1151_s2, 2048 }
 0x228   : > { %p767_p0 = scmp.ne.s32.totalorder %s1100_s8, %s766_s23  ;;  %p771_p1 = scmp.lt.s32.totalorder %s1100_s8, %s1151_s2 }
 0x229   : > { %p772_p3 = scmp.lt.s32.totalorder %s770_s29, %s766_s23 }
 0x22a   : > { %p768_p2 = pnand %p767_p0, %p1159_p12 }
 0x22b   : > { %p773_p6 = por %p772_p3, %p771_p1 }
 0x22c   : > { %p769_p9 = pneg %p768_p2 }
 0x22e   : > { %p774_p11 = pnand %p773_p6, %p769_p9 }
 0x230   : > { %777 = shalt.err (!%p774_p11)
}
 0x231   : > { %s825_s30 = smov 128   ;;  %s826_s3 = smov 8  }
 0x232   : > { %673 = dma.vmem_to_hbm [thread:$0]  (%p1159_p12), %s1102_s19, 1024, %s1100_s8, %s489_s13, %s825_s30, %s825_s30, %s826_s3  }
 0x233 PF: > { %s518_s6 = sand.u32 1, %s804_s9   ;;  %p1160_p13 = scmp.ne.s32.totalorder %s1156_s21, 0 }
 0x234   : > { %p1161_p4 = scmp.ge.s32.totalorder %s816_s12, 2  ;;  %s519_s27 = scalar_lea.sflag [#allocation5], %s518_s6 }
 0x236   : > { %p680_p5 = pnand %p1161_p4, %p1160_p13 }
 0x238   : > { %p681_p7 = pneg %p680_p5 }
 0x23a   : > { %799 = dma.done.wait (%p681_p7), %s519_s27, 1024  }
 0x23b   : > { %801 = vsyncadd (%p681_p7), %s519_s27, 4294966272  ;;  %p15_p8 = scmp.ge.s32.totalorder %s867_s15, 4   ;;  %s1162_s9 = smov %s808_s10 }
 0x23c   : > { %s1163_s10 = smov %s812_s11  ;;  %s1164_s11 = smov %s879_s18 }
 0x23d   : > { %s1165_s12 = smov %s867_s15  ;;  %17 = sbr.rel (!%p15_p8) target bundleno = 5 (0x5), region = 79 }
 0x242   :  { %524 = vsyncpa [#allocation4], 1 }
 0x243   :  { %526 = vsyncpa [#allocation4 + $0x1], 1 }
 0x244   :  { %527 = vsyncpa [#allocation5], 1 }
 0x245   :  { %529 = vsyncpa [#allocation5 + $0x1], 1 }

</bundles_post_ra>
